<compile_context>
chip_gen: v5e
topology: v5e:2x2
jax: 0.10.0
libtpu: 0.0.40
codegen_flags: <defaults>
</compile_context>

<pallas_src>
import jax
import jax.numpy as jnp
from jax.experimental import pallas as pl
from jax.experimental.pallas import tpu as pltpu

NUM_ZOOMBINIS = 16
NUM_BRIDGES = 2
ZOOMBINI_BRAIN_VECTOR_LENGTH = 5 * 4 + 3 * NUM_BRIDGES              # 26
BRAIN_INPUT_LENGTH = NUM_ZOOMBINIS * ZOOMBINI_BRAIN_VECTOR_LENGTH   # 416
OUTPUT_LENGTH = NUM_ZOOMBINIS * NUM_BRIDGES                         # 32


def oracle_kernel(x_ref, w1_ref, b1_ref, w2_ref, b2_ref, out_ref):
    # fc1 + ReLU  (MXU matmul, f32 accumulation; inputs may be f32 or bf16)
    h = jnp.dot(x_ref[...], w1_ref[...], preferred_element_type=jnp.float32)
    h = h + b1_ref[...]                      # b1 is (1, H) f32, broadcasts over batch
    h = jnp.maximum(h, 0.0)
    # fc2 + sigmoid (cast h back to the weight dtype so bf16 hits the bf16 MXU path)
    y = jnp.dot(h.astype(w2_ref.dtype), w2_ref[...],
                preferred_element_type=jnp.float32)
    y = y + b2_ref[...]                      # b2 is (1, OUTPUT_LENGTH) f32
    out_ref[...] = jax.nn.sigmoid(y).astype(out_ref.dtype)


def oracle_forward(x, w1, b1, w2, b2, *, tile_b=2048, use_bf16=False):
    """sigmoid(relu(x @ w1 + b1) @ w2 + b2), streamed over the batch dimension."""
    batch = x.shape[0]
    n_hidden = w1.shape[1]

    if use_bf16:
        # MXU inputs in bf16 (halves HBM bytes for x); accumulation, bias add
        # and sigmoid stay in f32 inside the kernel.
        x = x.astype(jnp.bfloat16)
        w1 = w1.astype(jnp.bfloat16)
        w2 = w2.astype(jnp.bfloat16)

    # Pick the batch tile.  Small batches use a single full-array block
    # (block dim == array dim satisfies the (8,128) rule); large batches are
    # padded up to a multiple of tile_b so every grid block is full.
    if batch <= tile_b:
        tile_b = batch
        padded_batch = batch
    else:
        padded_batch = ((batch + tile_b - 1) // tile_b) * tile_b

    if padded_batch != batch:
        x = jnp.pad(x, ((0, padded_batch - batch), (0, 0)))

    grid = (padded_batch // tile_b,)

    itemsize = jnp.dtype(x.dtype).itemsize
    cost = pl.CostEstimate(
        flops=2 * padded_batch * (BRAIN_INPUT_LENGTH * n_hidden
                                  + n_hidden * OUTPUT_LENGTH),
        transcendentals=padded_batch * OUTPUT_LENGTH,            # sigmoid
        bytes_accessed=(padded_batch * BRAIN_INPUT_LENGTH * itemsize      # x
                        + BRAIN_INPUT_LENGTH * n_hidden * itemsize        # w1
                        + n_hidden * OUTPUT_LENGTH * itemsize             # w2
                        + (n_hidden + OUTPUT_LENGTH) * 4                  # biases
                        + padded_batch * OUTPUT_LENGTH * 4),              # out
    )

    out = pl.pallas_call(
        oracle_kernel,
        out_shape=jax.ShapeDtypeStruct((padded_batch, OUTPUT_LENGTH), jnp.float32),
        grid=grid,
        in_specs=[
            # x: streamed / double-buffered, one batch tile per grid step.
            pl.BlockSpec((tile_b, BRAIN_INPUT_LENGTH), lambda i: (i, 0)),
            # Weights & biases: same block index every step -> VMEM-resident.
            pl.BlockSpec((BRAIN_INPUT_LENGTH, n_hidden), lambda i: (0, 0)),
            pl.BlockSpec((1, n_hidden), lambda i: (0, 0)),
            pl.BlockSpec((n_hidden, OUTPUT_LENGTH), lambda i: (0, 0)),
            pl.BlockSpec((1, OUTPUT_LENGTH), lambda i: (0, 0)),
        ],
        out_specs=pl.BlockSpec((tile_b, OUTPUT_LENGTH), lambda i: (i, 0)),
        compiler_params=pltpu.CompilerParams(
            dimension_semantics=("parallel",),   # batch tiles are independent
        ),
        cost_estimate=cost,
    )(x, w1, b1, w2, b2)

    return out[:batch] if padded_batch != batch else out


def init_params(key, n_hidden):
    """Deterministic synthetic parameters with nn.Linear-like init (U[-1/sqrt(fan_in), 1/sqrt(fan_in)])."""
    k1, k2, k3, k4 = jax.random.split(key, 4)
    bound1 = 1.0 / jnp.sqrt(float(BRAIN_INPUT_LENGTH))
    bound2 = 1.0 / jnp.sqrt(float(n_hidden))
    w1 = jax.random.uniform(k1, (BRAIN_INPUT_LENGTH, n_hidden),
                            minval=-bound1, maxval=bound1, dtype=jnp.float32)
    b1 = jax.random.uniform(k2, (1, n_hidden),
                            minval=-bound1, maxval=bound1, dtype=jnp.float32)
    w2 = jax.random.uniform(k3, (n_hidden, OUTPUT_LENGTH),
                            minval=-bound2, maxval=bound2, dtype=jnp.float32)
    b2 = jax.random.uniform(k4, (1, OUTPUT_LENGTH),
                            minval=-bound2, maxval=bound2, dtype=jnp.float32)
    return w1, b1, w2, b2


if __name__ == "__main__":
    n_hidden = 32
    batch = 256   # give the MXU/pipeline real rows; batch=2 is pure overhead

    key = jax.random.PRNGKey(0)
    k_x, k_p = jax.random.split(key)
    x = jax.random.normal(k_x, (batch, BRAIN_INPUT_LENGTH), dtype=jnp.float32)
    w1, b1, w2, b2 = init_params(k_p, n_hidden)

    # Reference in plain JAX (same math as the PyTorch forward).
    ref = jax.nn.sigmoid(jnp.maximum(x @ w1 + b1, 0.0) @ w2 + b2)

    # 1) f32 path (bit-faithful to the PyTorch module), single-tile grid.
    out = jax.block_until_ready(oracle_forward(x, w1, b1, w2, b2))
    assert out.shape == (batch, OUTPUT_LENGTH)
    assert jnp.allclose(out, ref, atol=1e-5, rtol=1e-5)

    # 2) Multi-tile path: batch > tile_b and not a multiple -> pad + slice.
    out_tiled = jax.block_until_ready(oracle_forward(x, w1, b1, w2, b2, tile_b=96))
    assert jnp.allclose(out_tiled, ref, atol=1e-5, rtol=1e-5)

    # 3) Tiny / ragged batch path (single full-array block, batch < 8).
    out_small = jax.block_until_ready(oracle_forward(x[:3], w1, b1, w2, b2))
    assert jnp.allclose(out_small, ref[:3], atol=1e-5, rtol=1e-5)

    # 4) bf16 MXU-input path (halves HBM bytes for x at large batch).
    out_bf16 = jax.block_until_ready(oracle_forward(x, w1, b1, w2, b2, use_bf16=True))
    assert jnp.allclose(out_bf16, ref, atol=2e-2, rtol=2e-2)

    # TODO(synk): training (Adam/BCELoss), predict() renormalization and
    # get_entropy() are host-side utilities, not part of forward -> not kernels.
    print("KERNEL_OK")
</pallas_src>

<mosaic_0001>
module attributes {stable_mosaic.version = 11 : i64} {
  func.func @oracle_kernel(%arg0: i32, %arg1: memref<256x416xf32, #tpu.memory_space<vmem>>, %arg2: memref<416x32xf32, #tpu.memory_space<vmem>>, %arg3: memref<1x32xf32, #tpu.memory_space<vmem>>, %arg4: memref<32x32xf32, #tpu.memory_space<vmem>>, %arg5: memref<1x32xf32, #tpu.memory_space<vmem>>, %arg6: memref<256x32xf32, #tpu.memory_space<vmem>>) attributes {dimension_semantics = [#tpu.dimension_semantics<parallel>], iteration_bounds = array<i64: 1>, scalar_prefetch = 0 : i64, scratch_operands = 0 : i64, tpu.core_type = #tpu.core_type<tc>, window_params = [{transform_indices = @transform_0, window_bounds = array<i64: 256, 416>}, {pipeline_mode = #tpu.pipeline_mode<synchronous>, transform_indices = @transform_1, window_bounds = array<i64: 416, 32>}, {pipeline_mode = #tpu.pipeline_mode<synchronous>, transform_indices = @transform_2, window_bounds = array<i64: 1, 32>}, {pipeline_mode = #tpu.pipeline_mode<synchronous>, transform_indices = @transform_3, window_bounds = array<i64: 32, 32>}, {pipeline_mode = #tpu.pipeline_mode<synchronous>, transform_indices = @transform_4, window_bounds = array<i64: 1, 32>}, {transform_indices = @transform_5, window_bounds = array<i64: 256, 32>}]} {
    %c0 = arith.constant 0 : index
    %c0_0 = arith.constant 0 : index
    %0 = vector.load %arg1[%c0, %c0_0] : memref<256x416xf32, #tpu.memory_space<vmem>>, vector<256x416xf32>
    %c0_1 = arith.constant 0 : index
    %c0_2 = arith.constant 0 : index
    %1 = vector.load %arg2[%c0_1, %c0_2] : memref<416x32xf32, #tpu.memory_space<vmem>>, vector<416x32xf32>
    %cst = arith.constant dense<0.000000e+00> : vector<256x32xf32>
    %2 = tpu.matmul %0, %1, %cst {dimension_numbers = #tpu.dot_dimension_numbers<[1], [0], [0], [1], [0, 0, 1, 1], [], []>} : vector<256x416xf32>, vector<416x32xf32>, vector<256x32xf32> -> vector<256x32xf32>
    %c0_3 = arith.constant 0 : index
    %c0_4 = arith.constant 0 : index
    %3 = vector.load %arg3[%c0_3, %c0_4] : memref<1x32xf32, #tpu.memory_space<vmem>>, vector<1x32xf32>
    %4 = vector.broadcast %3 : vector<1x32xf32> to vector<256x32xf32>
    %5 = arith.addf %2, %4 : vector<256x32xf32>
    %cst_5 = arith.constant 0.000000e+00 : f32
    %6 = vector.broadcast %cst_5 : f32 to vector<256x32xf32>
    %7 = arith.maximumf %5, %6 : vector<256x32xf32>
    %c0_6 = arith.constant 0 : index
    %c0_7 = arith.constant 0 : index
    %8 = vector.load %arg4[%c0_6, %c0_7] : memref<32x32xf32, #tpu.memory_space<vmem>>, vector<32x32xf32>
    %cst_8 = arith.constant dense<0.000000e+00> : vector<256x32xf32>
    %9 = tpu.matmul %7, %8, %cst_8 {dimension_numbers = #tpu.dot_dimension_numbers<[1], [0], [0], [1], [0, 0, 1, 1], [], []>} : vector<256x32xf32>, vector<32x32xf32>, vector<256x32xf32> -> vector<256x32xf32>
    %c0_9 = arith.constant 0 : index
    %c0_10 = arith.constant 0 : index
    %10 = vector.load %arg5[%c0_9, %c0_10] : memref<1x32xf32, #tpu.memory_space<vmem>>, vector<1x32xf32>
    %11 = vector.broadcast %10 : vector<1x32xf32> to vector<256x32xf32>
    %12 = arith.addf %9, %11 : vector<256x32xf32>
    %13 = arith.negf %12 : vector<256x32xf32>
    %14 = math.exp %13 : vector<256x32xf32>
    %cst_11 = arith.constant 1.000000e+00 : f32
    %15 = vector.broadcast %cst_11 : f32 to vector<256x32xf32>
    %16 = arith.addf %15, %14 : vector<256x32xf32>
    %17 = arith.divf %15, %16 : vector<256x32xf32>
    %c0_12 = arith.constant 0 : index
    %c0_13 = arith.constant 0 : index
    %18 = vector.load %arg6[%c0_12, %c0_13] : memref<256x32xf32, #tpu.memory_space<vmem>>, vector<256x32xf32>
    tpu.vector_store %arg6[%c0_12, %c0_13], %17 {strides = array<i32>} : memref<256x32xf32, #tpu.memory_space<vmem>>, vector<256x32xf32>,
    return
  }
  func.func @transform_0(%arg0: i32) -> (i32, i32) {
    %c0_i32 = arith.constant 0 : i32
    %c0_i32_0 = arith.constant 0 : i32
    return %arg0, %c0_i32 : i32, i32
  }
  func.func @transform_1(%arg0: i32) -> (i32, i32) {
    %c0_i32 = arith.constant 0 : i32
    %c0_i32_0 = arith.constant 0 : i32
    %c0_i32_1 = arith.constant 0 : i32
    return %c0_i32, %c0_i32_0 : i32, i32
  }
  func.func @transform_2(%arg0: i32) -> (i32, i32) {
    %c0_i32 = arith.constant 0 : i32
    %c0_i32_0 = arith.constant 0 : i32
    %c0_i32_1 = arith.constant 0 : i32
    return %c0_i32, %c0_i32_0 : i32, i32
  }
  func.func @transform_3(%arg0: i32) -> (i32, i32) {
    %c0_i32 = arith.constant 0 : i32
    %c0_i32_0 = arith.constant 0 : i32
    %c0_i32_1 = arith.constant 0 : i32
    return %c0_i32, %c0_i32_0 : i32, i32
  }
  func.func @transform_4(%arg0: i32) -> (i32, i32) {
    %c0_i32 = arith.constant 0 : i32
    %c0_i32_0 = arith.constant 0 : i32
    %c0_i32_1 = arith.constant 0 : i32
    return %c0_i32, %c0_i32_0 : i32, i32
  }
  func.func @transform_5(%arg0: i32) -> (i32, i32) {
    %c0_i32 = arith.constant 0 : i32
    %c0_i32_0 = arith.constant 0 : i32
    return %arg0, %c0_i32 : i32, i32
  }
}

</mosaic_0001>

<bundles_post_ra>
// kernel: tpu_custom_call.1
= control target key start
LH: loop header
LB: loop body
LE: loop exit
PB: predicated region body
PF: predicated region fallthrough
CT: control target
= control target key end

     0   :  { %vm204_vm0 = vcmask 261120   ;;  %s3087_s1 = inlined_call_operand.vmem [shape: f32[416,32], index: 1, kind: input, shape index: {}]   ;;  %s3088_s2 = inlined_call_operand.vmem [shape: f32[1,32], index: 2, kind: input, shape index: {}]   ;;  %s3089_s0 = inlined_call_operand.vmem [shape: f32[256,416], index: 0, kind: input, shape index: {}]   ;;  %s3090_s3 = inlined_call_operand.vmem [shape: f32[32,32], index: 3, kind: input, shape index: {}]   ;;  %s3091_s4 = inlined_call_operand.vmem [shape: f32[1,32], index: 4, kind: input, shape index: {}]   ;;  %s3092_s5 = inlined_call_operand.vmem [shape: f32[256,32], index: 5, kind: output, shape index: {}]  }
   0x1   :  { %v163_v0 = vld [vmem:[%s3087_s1 + $0x78] sm:$0xff]  ;;  %v162_v1 = vld [vmem:[%s3087_s1 + $0x70] sm:$0xff]  ;;  %v161_v2 = vld [vmem:[%s3087_s1 + $0x68] sm:$0xff] }
   0x2   :  { %301 = vmatpush.msra.mxu0 %v163_v0  ;;  %1742 = vmatpush.msra.mxu1 %v163_v0  ;;  %v160_v3 = vld [vmem:[%s3087_s1 + $0x60] sm:$0xff]  ;;  %v159_v4 = vld [vmem:[%s3087_s1 + $0x58] sm:$0xff]  ;;  %v158_v6 = vld [vmem:[%s3087_s1 + $0x50] sm:$0xff] }
   0x3   :  { %1743 = vmatpush.msra.mxu2 %v163_v0  ;;  %v199_v5 = vld [vmem:[%s3087_s1 + $0x198] sm:$0xff]  ;;  %v157_v7 = vld [vmem:[%s3087_s1 + $0x48] sm:$0xff]  ;;  %v156_v8 = vld [vmem:[%s3087_s1 + $0x40] sm:$0xff] }
   0x4   :  { %302 = vmatpush.msra.mxu0 %v162_v1  ;;  %1744 = vmatpush.msra.mxu1 %v162_v1  ;;  %v155_v9 = vld [vmem:[%s3087_s1 + $0x38] sm:$0xff]  ;;  %v154_v10 = vld [vmem:[%s3087_s1 + $0x30] sm:$0xff]  ;;  %v153_v11 = vld [vmem:[%s3087_s1 + $0x28] sm:$0xff] }
   0x5   :  { %1745 = vmatpush.msra.mxu2 %v162_v1  ;;  %1774 = vmatpush.msra.mxu3 %v199_v5  ;;  %v152_v12 = vld [vmem:[%s3087_s1 + $0x20] sm:$0xff]  ;;  %v151_v13 = vld [vmem:[%s3087_s1 + $0x18] sm:$0xff]  ;;  %v150_v14 = vld [vmem:[%s3087_s1 + $0x10] sm:$0xff] }
   0x6   :  { %303 = vmatpush.msra.mxu0 %v161_v2  ;;  %1746 = vmatpush.msra.mxu1 %v161_v2  ;;  %v149_v15 = vld [vmem:[%s3087_s1 + $0x8] sm:$0xff]  ;;  %v148_v16 = vld [vmem:[%s3087_s1] sm:$0xff]  ;;  %v195_v20 = vld [vmem:[%s3087_s1 + $0x178] sm:$0xff] }
   0x7   :  { %1747 = vmatpush.msra.mxu2 %v161_v2  ;;  %v20_v17 = vld [vmem:[%s3089_s0] sm:$0xff]  ;;  %v179_v21 = vld [vmem:[%s3087_s1 + $0xf8] sm:$0xff]  ;;  %v178_v22 = vld [vmem:[%s3087_s1 + $0xf0] sm:$0xff] }
   0x8   :  { %304 = vmatpush.msra.mxu0 %v160_v3  ;;  %1748 = vmatpush.msra.mxu1 %v160_v3  ;;  %v96_v18 = vld [vmem:[%s3089_s0 + $0x260] sm:$0xff]  ;;  %v194_v23 = vld [vmem:[%s3087_s1 + $0x170] sm:$0xff]  ;;  %v177_v25 = vld [vmem:[%s3087_s1 + $0xe8] sm:$0xff] }
   0x9   :  { %1749 = vmatpush.msra.mxu2 %v160_v3  ;;  %v128_v19 = vld [vmem:[%s3089_s0 + $0x360] sm:$0xff]  ;;  %v198_v24 = vld [vmem:[%s3087_s1 + $0x190] sm:$0xff]  ;;  %v193_v26 = vld [vmem:[%s3087_s1 + $0x168] sm:$0xff] }
   0xa   :  { %305 = vmatpush.msra.mxu0 %v159_v4  ;;  %1750 = vmatpush.msra.mxu1 %v159_v4  ;;  %v24_v27 = vld [vmem:[%s3089_s0 + $0x20] sm:$0xff]  ;;  %v191_v32 = vld [vmem:[%s3087_s1 + $0x158] sm:$0xff]  ;;  %v190_v34 = vld [vmem:[%s3087_s1 + $0x150] sm:$0xff] }
   0xb   :  { %1751 = vmatpush.msra.mxu2 %v159_v4  ;;  %1775 = vmatpush.msra.mxu3 %v198_v24  ;;  %v100_v28 = vld [vmem:[%s3089_s0 + $0x280] sm:$0xff]  ;;  %v175_v33 = vld [vmem:[%s3087_s1 + $0xd8] sm:$0xff]  ;;  %v174_v35 = vld [vmem:[%s3087_s1 + $0xd0] sm:$0xff] }
   0xc   :  { %306 = vmatpush.msra.mxu0 %v158_v6  ;;  %1752 = vmatpush.msra.mxu1 %v158_v6  ;;  %v192_v29 = vld [vmem:[%s3087_s1 + $0x160] sm:$0xff]  ;;  %v189_v36 = vld [vmem:[%s3087_s1 + $0x148] sm:$0xff]  ;;  %v187_v43 = vld [vmem:[%s3087_s1 + $0x138] sm:$0xff] }
   0xd   :  { %1753 = vmatpush.msra.mxu2 %v158_v6  ;;  %v176_v30 = vld [vmem:[%s3087_s1 + $0xe0] sm:$0xff]  ;;  %v173_v37 = vld [vmem:[%s3087_s1 + $0xc8] sm:$0xff]  ;;  %v171_v44 = vld [vmem:[%s3087_s1 + $0xb8] sm:$0xff] }
   0xe   :  { %307 = vmatpush.msra.mxu0 %v157_v7  ;;  %1754 = vmatpush.msra.mxu1 %v157_v7  ;;  %v132_v31 = vld [vmem:[%s3089_s0 + $0x380] sm:$0xff]  ;;  %v186_v45 = vld [vmem:[%s3087_s1 + $0x130] sm:$0xff]  ;;  %v185_v47 = vld [vmem:[%s3087_s1 + $0x128] sm:$0xff] }
   0xf   :  { %1755 = vmatpush.msra.mxu2 %v157_v7  ;;  %v28_v38 = vld [vmem:[%s3089_s0 + $0x40] sm:$0xff]  ;;  %v170_v46 = vld [vmem:[%s3087_s1 + $0xb0] sm:$0xff]  ;;  %v169_v48 = vld [vmem:[%s3087_s1 + $0xa8] sm:$0xff] }
  0x10   :  { %308 = vmatpush.msra.mxu0 %v156_v8  ;;  %1756 = vmatpush.msra.mxu1 %v156_v8  ;;  %v104_v39 = vld [vmem:[%s3089_s0 + $0x2a0] sm:$0xff]  ;;  %v183_v54 = vld [vmem:[%s3087_s1 + $0x118] sm:$0xff]  ;;  %v182_v56 = vld [vmem:[%s3087_s1 + $0x110] sm:$0xff] }
  0x11   :  { %1757 = vmatpush.msra.mxu2 %v156_v8  ;;  %v188_v40 = vld [vmem:[%s3087_s1 + $0x140] sm:$0xff]  ;;  %v167_v55 = vld [vmem:[%s3087_s1 + $0x98] sm:$0xff]  ;;  %v166_v57 = vld [vmem:[%s3087_s1 + $0x90] sm:$0xff] }
  0x12   :  { %309 = vmatpush.msra.mxu0 %v155_v9  ;;  %1758 = vmatpush.msra.mxu1 %v155_v9  ;;  %v172_v41 = vld [vmem:[%s3087_s1 + $0xc0] sm:$0xff]  ;;  %v181_v58 = vld [vmem:[%s3087_s1 + $0x108] sm:$0xff]  ;;  %v22_v3 = vld [vmem:[%s3089_s0 + $0x10] sm:$0xff] }
  0x13   :  { %1759 = vmatpush.msra.mxu2 %v155_v9  ;;  %v136_v42 = vld [vmem:[%s3089_s0 + $0x3a0] sm:$0xff]  ;;  %v165_v59 = vld [vmem:[%s3087_s1 + $0x88] sm:$0xff]  ;;  %v26_v7 = vld [vmem:[%s3089_s0 + $0x30] sm:$0xff] }
  0x14   :  { %310 = vmatpush.msra.mxu0 %v154_v10  ;;  %1760 = vmatpush.msra.mxu1 %v154_v10  ;;  %v32_v49 = vld [vmem:[%s3089_s0 + $0x60] sm:$0xff]  ;;  %v197_v4 = vld [vmem:[%s3087_s1 + $0x188] sm:$0xff] }
  0x15   :  { %1761 = vmatpush.msra.mxu2 %v154_v10  ;;  %v108_v50 = vld [vmem:[%s3089_s0 + $0x2c0] sm:$0xff]  ;;  %1776 = vmatpush.msra.mxu3 %v197_v4  ;;  %v30_v10 = vld [vmem:[%s3089_s0 + $0x50] sm:$0xff] }
  0x16   :  { %311 = vmatpush.msra.mxu0 %v153_v11  ;;  %1762 = vmatpush.msra.mxu1 %v153_v11  ;;  %v184_v51 = vld [vmem:[%s3087_s1 + $0x120] sm:$0xff] }
  0x17   :  { %1763 = vmatpush.msra.mxu2 %v153_v11  ;;  %v168_v52 = vld [vmem:[%s3087_s1 + $0xa0] sm:$0xff] }
  0x18   :  { %312 = vmatpush.msra.mxu0 %v152_v12  ;;  %1764 = vmatpush.msra.mxu1 %v152_v12  ;;  %v140_v53 = vld [vmem:[%s3089_s0 + $0x3c0] sm:$0xff] }
  0x19   :  { %1765 = vmatpush.msra.mxu2 %v152_v12  ;;  %v36_v60 = vld [vmem:[%s3089_s0 + $0x80] sm:$0xff]  ;;  %v21_v12 = vld [vmem:[%s3089_s0 + $0x8] sm:$0xff] }
  0x1a   :  { %313 = vmatpush.msra.mxu0 %v151_v13  ;;  %1766 = vmatpush.msra.mxu1 %v151_v13  ;;  %v112_v61 = vld [vmem:[%s3089_s0 + $0x2e0] sm:$0xff] }
  0x1b   :  { %1767 = vmatpush.msra.mxu2 %v151_v13  ;;  %v180_v62 = vld [vmem:[%s3087_s1 + $0x100] sm:$0xff]  ;;  %v34_v13 = vld [vmem:[%s3089_s0 + $0x70] sm:$0xff] }
  0x1c   :  { %314 = vmatpush.msra.mxu0 %v150_v14  ;;  %1768 = vmatpush.msra.mxu1 %v150_v14  ;;  %v164_v63 = vld [vmem:[%s3087_s1 + $0x80] sm:$0xff] }
  0x1d   :  { %1769 = vmatpush.msra.mxu2 %v150_v14  ;;  %v144_v0 = vld [vmem:[%s3089_s0 + $0x3e0] sm:$0xff] }
  0x1e   :  { %315 = vmatpush.msra.mxu0 %v149_v15  ;;  %1770 = vmatpush.msra.mxu1 %v149_v15  ;;  %v40_v1 = vld [vmem:[%s3089_s0 + $0xa0] sm:$0xff] }
  0x1f   :  { %1771 = vmatpush.msra.mxu2 %v149_v15  ;;  %v116_v2 = vld [vmem:[%s3089_s0 + $0x300] sm:$0xff]  ;;  %v25_v15 = vld [vmem:[%s3089_s0 + $0x28] sm:$0xff] }
  0x20   :  { %316 = vmatpush.msra.mxu0 %v148_v16  ;;  %1772 = vmatpush.msra.mxu1 %v148_v16  ;;  %v120_v6 = vld [vmem:[%s3089_s0 + $0x320] sm:$0xff] }
  0x21   :  { %317 = vmatmul.f32.vlgmr.msra.gmra.mxu0 %v20_v17  ;;  %374 = vmatmul.f32.vlgmr.msra.gmra.mxu1 %v96_v18  ;;  %v48_v8 = vld [vmem:[%s3089_s0 + $0xe0] sm:$0xff]  ;;  %v29_v18 = vld [vmem:[%s3089_s0 + $0x48] sm:$0xff] }
  0x22   :  { %652 = vmatpush.msrb.mxu0 %v199_v5  ;;  %1773 = vmatpush.msra.mxu2 %v148_v16  ;;  %v44_v5 = vld [vmem:[%s3089_s0 + $0xc0] sm:$0xff]  ;;  %v38_v16 = vld [vmem:[%s3089_s0 + $0x90] sm:$0xff] }
  0x23   :  { %398 = vmatmul.f32.vlgmr.msra.gmra.mxu2 %v128_v19  ;;  %414 = vmatpush.msrb.mxu1 %v179_v21  ;;  %v124_v9 = vld [vmem:[%s3089_s0 + $0x340] sm:$0xff]  ;;  %v42_v19 = vld [vmem:[%s3089_s0 + $0xb0] sm:$0xff] }
  0x24   :  { %527 = vmatpush.msrb.mxu2 %v195_v20  ;;  %653 = vmatpush.msrb.mxu0 %v198_v24  ;;  %v52_v11 = vld [vmem:[%s3089_s0 + $0x100] sm:$0xff] }
  0x25   :  { %415 = vmatpush.msrb.mxu1 %v178_v22  ;;  %v56_v14 = vld [vmem:[%s3089_s0 + $0x120] sm:$0xff]  ;;  %v33_v22 = vld [vmem:[%s3089_s0 + $0x68] sm:$0xff] }
  0x26   :  { %528 = vmatpush.msrb.mxu2 %v194_v23  ;;  %654 = vmatpush.msrb.mxu0 %v197_v4  ;;  %v60_v17 = vld [vmem:[%s3089_s0 + $0x140] sm:$0xff]  ;;  %v46_v23 = vld [vmem:[%s3089_s0 + $0xd0] sm:$0xff] }
  0x27   :  { %416 = vmatpush.msrb.mxu1 %v177_v25  ;;  %v196_v20 = vld [vmem:[%s3087_s1 + $0x180] sm:$0xff]  ;;  %v37_v25 = vld [vmem:[%s3089_s0 + $0x88] sm:$0xff] }
  0x28   :  { %529 = vmatpush.msrb.mxu2 %v193_v26  ;;  %655 = vmatpush.msrb.mxu0 %v196_v20  ;;  %v64_v21 = vld [vmem:[%s3089_s0 + $0x160] sm:$0xff]  ;;  %v50_v26 = vld [vmem:[%s3089_s0 + $0xf0] sm:$0xff] }
  0x29   :  { %320 = vmatmul.f32.gmra.mxu0 %v24_v27  ;;  %377 = vmatmul.f32.gmra.mxu1 %v100_v28  ;;  %v68_v24 = vld [vmem:[%s3089_s0 + $0x180] sm:$0xff]  ;;  %v41_v28 = vld [vmem:[%s3089_s0 + $0xa8] sm:$0xff] }
  0x2a   :  { %530 = vmatpush.msrb.mxu2 %v192_v29  ;;  %417 = vmatpush.msrb.mxu1 %v176_v30  ;;  %v72_v27 = vld [vmem:[%s3089_s0 + $0x1a0] sm:$0xff]  ;;  %v54_v29 = vld [vmem:[%s3089_s0 + $0x110] sm:$0xff] }
  0x2b   :  { %401 = vmatmul.f32.gmra.mxu2 %v132_v31  ;;  %1777 = vmatpush.msra.mxu3 %v196_v20  ;;  %v76_v30 = vld [vmem:[%s3089_s0 + $0x1c0] sm:$0xff]  ;;  %v45_v31 = vld [vmem:[%s3089_s0 + $0xc8] sm:$0xff]  ;;  %v39_v20 = vld [vmem:[%s3089_s0 + $0x98] sm:$0xff] }
  0x2c   :  { %531 = vmatpush.msrb.mxu2 %v191_v32  ;;  %418 = vmatpush.msrb.mxu1 %v175_v33  ;;  %v58_v32 = vld [vmem:[%s3089_s0 + $0x130] sm:$0xff]  ;;  %v80_v33 = vld [vmem:[%s3089_s0 + $0x1e0] sm:$0xff] }
  0x2e   :  { %532 = vmatpush.msrb.mxu2 %v190_v34  ;;  %419 = vmatpush.msrb.mxu1 %v174_v35  ;;  %v49_v34 = vld [vmem:[%s3089_s0 + $0xe8] sm:$0xff]  ;;  %v62_v35 = vld [vmem:[%s3089_s0 + $0x150] sm:$0xff] }
  0x30   :  { %533 = vmatpush.msrb.mxu2 %v189_v36  ;;  %420 = vmatpush.msrb.mxu1 %v173_v37 }
  0x31   :  { %323 = vmatmul.f32.gmra.mxu0 %v28_v38  ;;  %380 = vmatmul.f32.gmra.mxu1 %v104_v39  ;;  %v84_v38 = vld [vmem:[%s3089_s0 + $0x200] sm:$0xff]  ;;  %v53_v39 = vld [vmem:[%s3089_s0 + $0x108] sm:$0xff] }
  0x32   :  { %534 = vmatpush.msrb.mxu2 %v188_v40  ;;  %421 = vmatpush.msrb.mxu1 %v172_v41  ;;  %v66_v40 = vld [vmem:[%s3089_s0 + $0x170] sm:$0xff] }
  0x33   :  { %404 = vmatmul.f32.gmra.mxu2 %v136_v42 }
  0x34   :  { %535 = vmatpush.msrb.mxu2 %v187_v43  ;;  %422 = vmatpush.msrb.mxu1 %v171_v44  ;;  %v88_v43 = vld [vmem:[%s3089_s0 + $0x220] sm:$0xff]  ;;  %v57_v44 = vld [vmem:[%s3089_s0 + $0x128] sm:$0xff] }
  0x36   :  { %536 = vmatpush.msrb.mxu2 %v186_v45  ;;  %423 = vmatpush.msrb.mxu1 %v170_v46  ;;  %v70_v46 = vld [vmem:[%s3089_s0 + $0x190] sm:$0xff] }
  0x38   :  { %537 = vmatpush.msrb.mxu2 %v185_v47  ;;  %424 = vmatpush.msrb.mxu1 %v169_v48 }
  0x39   :  { %326 = vmatmul.f32.gmra.mxu0 %v32_v49  ;;  %383 = vmatmul.f32.gmra.mxu1 %v108_v50  ;;  %v92_v49 = vld [vmem:[%s3089_s0 + $0x240] sm:$0xff]  ;;  %v61_v50 = vld [vmem:[%s3089_s0 + $0x148] sm:$0xff] }
  0x3a   :  { %538 = vmatpush.msrb.mxu2 %v184_v51  ;;  %425 = vmatpush.msrb.mxu1 %v168_v52  ;;  %v74_v52 = vld [vmem:[%s3089_s0 + $0x1b0] sm:$0xff] }
  0x3b   :  { %407 = vmatmul.f32.gmra.mxu2 %v140_v53 }
  0x3c   :  { %539 = vmatpush.msrb.mxu2 %v183_v54  ;;  %426 = vmatpush.msrb.mxu1 %v167_v55  ;;  %v65_v55 = vld [vmem:[%s3089_s0 + $0x168] sm:$0xff] }
  0x3e   :  { %540 = vmatpush.msrb.mxu2 %v182_v56  ;;  %427 = vmatpush.msrb.mxu1 %v166_v57  ;;  %v23_v56 = vld [vmem:[%s3089_s0 + $0x18] sm:$0xff] }
  0x40   :  { %541 = vmatpush.msrb.mxu2 %v181_v58  ;;  %428 = vmatpush.msrb.mxu1 %v165_v59  ;;  %v78_v58 = vld [vmem:[%s3089_s0 + $0x1d0] sm:$0xff] }
  0x41   :  { %329 = vmatmul.f32.gmra.mxu0 %v36_v60  ;;  %386 = vmatmul.f32.gmra.mxu1 %v112_v61  ;;  %v69_v61 = vld [vmem:[%s3089_s0 + $0x188] sm:$0xff] }
  0x42   :  { %542 = vmatpush.msrb.mxu2 %v180_v62  ;;  %429 = vmatpush.msrb.mxu1 %v164_v63  ;;  %v27_v62 = vld [vmem:[%s3089_s0 + $0x38] sm:$0xff] }
  0x43   :  { %410 = vmatmul.f32.gmra.mxu2 %v144_v0  ;;  %v82_v0 = vld [vmem:[%s3089_s0 + $0x1f0] sm:$0xff] }
  0x49   :  { %332 = vmatmul.f32.gmra.mxu0 %v40_v1  ;;  %389 = vmatmul.f32.gmra.mxu1 %v116_v2  ;;  %v107_v1 = vld [vmem:[%s3089_s0 + $0x2b8] sm:$0xff] }
  0x4a   :  { %v788_v2 = vld [vmem:[%s3090_s3 + $0x18] sm:$0xff]  ;;  %1667 = vmatmul.msk.f32.vlgmr.msra.gmra.mxu3 %vm204_vm0, %v107_v1 }
  0x4b   :  { %543 = vmatmul.f32.vlgmr.msrb.gmra.mxu2 %v22_v3  ;;  %901 = vmatpush.msrb.mxu3 %v788_v2  ;;  %v110_v2 = vld [vmem:[%s3089_s0 + $0x2d0] sm:$0xff] }
  0x51   :  { %335 = vmatmul.f32.gmra.mxu0 %v44_v5  ;;  %392 = vmatmul.f32.gmra.mxu1 %v120_v6  ;;  %v73_v5 = vld [vmem:[%s3089_s0 + $0x1a8] sm:$0xff]  ;;  %v31_v6 = vld [vmem:[%s3089_s0 + $0x58] sm:$0xff] }
  0x53   :  { %546 = vmatmul.f32.gmra.mxu2 %v26_v7 }
  0x59   :  { %338 = vmatmul.f32.gmra.mxu0 %v48_v8  ;;  %395 = vmatmul.f32.gmra.mxu1 %v124_v9  ;;  %v86_v8 = vld [vmem:[%s3089_s0 + $0x210] sm:$0xff]  ;;  %v111_v9 = vld [vmem:[%s3089_s0 + $0x2d8] sm:$0xff] }
  0x5a   :  { %1668 = vmatmul.msk.f32.gmra.mxu3 %vm204_vm0, %v111_v9  ;;  %v101_v9 = vld [vmem:[%s3089_s0 + $0x288] sm:$0xff] }
  0x5b   :  { %549 = vmatmul.f32.gmra.mxu2 %v30_v10 }
  0x61   :  { %341 = vmatmul.f32.gmra.mxu0 %v52_v11  ;;  %430 = vmatmul.f32.vlgmr.msrb.gmra.mxu1 %v21_v12  ;;  %v77_v12 = vld [vmem:[%s3089_s0 + $0x1c8] sm:$0xff] }
  0x63   :  { %552 = vmatmul.f32.gmra.mxu2 %v34_v13  ;;  %v35_v13 = vld [vmem:[%s3089_s0 + $0x78] sm:$0xff] }
  0x69   :  { %344 = vmatmul.f32.gmra.mxu0 %v56_v14  ;;  %433 = vmatmul.f32.gmra.mxu1 %v25_v15  ;;  %v90_v15 = vld [vmem:[%s3089_s0 + $0x230] sm:$0xff] }
  0x6b   :  { %555 = vmatmul.f32.gmra.mxu2 %v38_v16  ;;  %v115_v16 = vld [vmem:[%s3089_s0 + $0x2f8] sm:$0xff] }
  0x6c   :  { %1669 = vmatmul.msk.f32.gmra.mxu3 %vm204_vm0, %v115_v16  ;;  %v139_v16 = vld [vmem:[%s3089_s0 + $0x3b8] sm:$0xff] }
  0x71   :  { %347 = vmatmul.f32.gmra.mxu0 %v60_v17  ;;  %436 = vmatmul.f32.gmra.mxu1 %v29_v18 }
  0x73   :  { %558 = vmatmul.f32.gmra.mxu2 %v42_v19  ;;  %v81_v19 = vld [vmem:[%s3089_s0 + $0x1e8] sm:$0xff] }
  0x79   :  { %350 = vmatmul.f32.gmra.mxu0 %v64_v21  ;;  %439 = vmatmul.f32.gmra.mxu1 %v33_v22  ;;  %v94_v22 = vld [vmem:[%s3089_s0 + $0x250] sm:$0xff] }
  0x7b   :  { %561 = vmatmul.f32.gmra.mxu2 %v46_v23  ;;  %v787_v23 = vld [vmem:[%s3090_s3 + $0x10] sm:$0xff] }
  0x7c   :  { %902 = vmatpush.msrb.mxu3 %v787_v23  ;;  %v105_v23 = vld [vmem:[%s3089_s0 + $0x2a8] sm:$0xff] }
  0x81   :  { %353 = vmatmul.f32.gmra.mxu0 %v68_v24  ;;  %442 = vmatmul.f32.gmra.mxu1 %v37_v25  ;;  %v119_v24 = vld [vmem:[%s3089_s0 + $0x318] sm:$0xff] }
  0x82   :  { %1670 = vmatmul.msk.f32.gmra.mxu3 %vm204_vm0, %v119_v24  ;;  %v63_v24 = vld [vmem:[%s3089_s0 + $0x158] sm:$0xff] }
  0x83   :  { %564 = vmatmul.f32.gmra.mxu2 %v50_v26 }
  0x89   :  { %356 = vmatmul.f32.gmra.mxu0 %v72_v27  ;;  %445 = vmatmul.f32.gmra.mxu1 %v41_v28  ;;  %v85_v27 = vld [vmem:[%s3089_s0 + $0x208] sm:$0xff]  ;;  %v43_v28 = vld [vmem:[%s3089_s0 + $0xb8] sm:$0xff] }
  0x8b   :  { %567 = vmatmul.f32.gmra.mxu2 %v54_v29 }
  0x91   :  { %359 = vmatmul.f32.gmra.mxu0 %v76_v30  ;;  %448 = vmatmul.f32.gmra.mxu1 %v45_v31  ;;  %v98_v30 = vld [vmem:[%s3089_s0 + $0x270] sm:$0xff]  ;;  %v123_v31 = vld [vmem:[%s3089_s0 + $0x338] sm:$0xff] }
  0x92   :  { %1671 = vmatmul.msk.f32.gmra.mxu3 %vm204_vm0, %v123_v31 }
  0x93   :  { %570 = vmatmul.f32.gmra.mxu2 %v58_v32 }
  0x99   :  { %362 = vmatmul.f32.gmra.mxu0 %v80_v33  ;;  %451 = vmatmul.f32.gmra.mxu1 %v49_v34  ;;  %v89_v34 = vld [vmem:[%s3089_s0 + $0x228] sm:$0xff] }
  0x9b   :  { %573 = vmatmul.f32.gmra.mxu2 %v62_v35  ;;  %v47_v35 = vld [vmem:[%s3089_s0 + $0xd8] sm:$0xff] }
  0x9e   :  { %v2239_v36 = vpop.f32.mrf.mxu0  ;;  %v2241_v37 = vpop.f32.mrf.mxu1 }
  0xa1   :  { %365 = vmatmul.f32.gmra.mxu0 %v84_v38  ;;  %454 = vmatmul.f32.gmra.mxu1 %v53_v39  ;;  %v102_v39 = vld [vmem:[%s3089_s0 + $0x290] sm:$0xff] }
  0xa3   :  { %576 = vmatmul.f32.gmra.mxu2 %v66_v40  ;;  %v127_v40 = vld [vmem:[%s3089_s0 + $0x358] sm:$0xff] }
  0xa4   :  { %1672 = vmatmul.msk.f32.gmra.mxu3 %vm204_vm0, %v127_v40 }
  0xa6   :  { %v2252_v41 = vpop.f32.mrf.mxu0  ;;  %v2254_v42 = vpop.f32.mrf.mxu1 }
  0xa7   :  { %v2262_v45 = vpop.f32.mrf.mxu2 }
  0xa9   :  { %368 = vmatmul.f32.gmra.mxu0 %v88_v43  ;;  %457 = vmatmul.f32.gmra.mxu1 %v57_v44 }
  0xab   :  { %579 = vmatmul.f32.gmra.mxu2 %v70_v46  ;;  %v93_v46 = vld [vmem:[%s3089_s0 + $0x248] sm:$0xff] }
  0xae   :  { %v2267_v47 = vpop.f32.mrf.mxu0  ;;  %v2269_v48 = vpop.f32.mrf.mxu1 }
  0xaf   :  { %v2277_v51 = vpop.f32.mrf.mxu2 }
  0xb0   :  { %3093 = vst [vmem:[#allocation2_spill] sm:$0xff] %v2277_v51 }
  0xb1   :  { %371 = vmatmul.f32.gmra.mxu0 %v92_v49  ;;  %460 = vmatmul.f32.gmra.mxu1 %v61_v50  ;;  %v51_v49 = vld [vmem:[%s3089_s0 + $0xf8] sm:$0xff] }
  0xb3   :  { %582 = vmatmul.f32.gmra.mxu2 %v74_v52  ;;  %v786_v52 = vld [vmem:[%s3090_s3 + $0x8] sm:$0xff] }
  0xb4   :  { %903 = vmatpush.msrb.mxu3 %v786_v52 }
  0xb6   :  { %v2282_v53 = vpop.f32.mrf.mxu0  ;;  %v2284_v54 = vpop.f32.mrf.mxu1 }
  0xb7   :  { %v2292_v57 = vpop.f32.mrf.mxu2 }
  0xb8   :  { %3094 = vst [vmem:[#allocation3_spill] sm:$0xff] %v2292_v57  ;;  %v87_v57 = vld [vmem:[%s3089_s0 + $0x218] sm:$0xff] }
  0xb9   :  { %463 = vmatmul.f32.gmra.mxu1 %v65_v55  ;;  %1646 = vmatmul.msk.f32.vlgmr.msrb.gmra.mxu0 %vm204_vm0, %v23_v56  ;;  %v106_v55 = vld [vmem:[%s3089_s0 + $0x2b0] sm:$0xff]  ;;  %v131_v56 = vld [vmem:[%s3089_s0 + $0x378] sm:$0xff] }
  0xba   :  { %1673 = vmatmul.msk.f32.gmra.mxu3 %vm204_vm0, %v131_v56  ;;  %v113_v56 = vld [vmem:[%s3089_s0 + $0x2e8] sm:$0xff] }
  0xbb   :  { %585 = vmatmul.f32.gmra.mxu2 %v78_v58 }
  0xbe   :  { %v2298_v59 = vpop.f32.mrf.mxu0  ;;  %v2300_v60 = vpop.f32.mrf.mxu1 }
  0xbf   :  { %v2308_v63 = vpop.f32.mrf.mxu2 }
  0xc0   :  { %3095 = vst [vmem:[#allocation4_spill] sm:$0xff] %v2308_v63 }
  0xc1   :  { %466 = vmatmul.f32.gmra.mxu1 %v69_v61  ;;  %1647 = vmatmul.msk.f32.gmra.mxu0 %vm204_vm0, %v27_v62  ;;  %v97_v62 = vld [vmem:[%s3089_s0 + $0x268] sm:$0xff] }
  0xc3   :  { %588 = vmatmul.f32.gmra.mxu2 %v82_v0  ;;  %v55_v0 = vld [vmem:[%s3089_s0 + $0x118] sm:$0xff] }
  0xc6   :  { %v2321_v3 = vpop.f32.mrf.mxu0  ;;  %v2323_v4 = vpop.f32.mrf.mxu1 }
  0xc7   :  { %v2331_v7 = vpop.f32.mrf.mxu2 }
  0xc9   :  { %469 = vmatmul.f32.gmra.mxu1 %v73_v5  ;;  %1648 = vmatmul.msk.f32.gmra.mxu0 %vm204_vm0, %v31_v6  ;;  %v135_v5 = vld [vmem:[%s3089_s0 + $0x398] sm:$0xff] }
  0xca   :  { %1674 = vmatmul.msk.f32.gmra.mxu3 %vm204_vm0, %v135_v5 }
  0xcb   :  { %591 = vmatmul.f32.gmra.mxu2 %v86_v8 }
  0xce   :  { %v2341_v10 = vpop.f32.mrf.mxu0  ;;  %v2343_v11 = vpop.f32.mrf.mxu1 }
  0xcf   :  { %v2351_v14 = vpop.f32.mrf.mxu2 }
  0xd1   :  { %472 = vmatmul.f32.gmra.mxu1 %v77_v12  ;;  %1649 = vmatmul.msk.f32.gmra.mxu0 %vm204_vm0, %v35_v13  ;;  %v59_v12 = vld [vmem:[%s3089_s0 + $0x138] sm:$0xff] }
  0xd2   :  { %1675 = vmatmul.msk.f32.gmra.mxu3 %vm204_vm0, %v139_v16 }
  0xd3   :  { %594 = vmatmul.f32.gmra.mxu2 %v90_v15  ;;  %v114_v15 = vld [vmem:[%s3089_s0 + $0x2f0] sm:$0xff] }
  0xd6   :  { %v2361_v17 = vpop.f32.mrf.mxu0  ;;  %v2363_v18 = vpop.f32.mrf.mxu1 }
  0xd7   :  { %v2371_v21 = vpop.f32.mrf.mxu2 }
  0xd9   :  { %475 = vmatmul.f32.gmra.mxu1 %v81_v19  ;;  %1650 = vmatmul.msk.f32.gmra.mxu0 %vm204_vm0, %v39_v20  ;;  %v785_v19 = vld [vmem:[%s3090_s3] sm:$0xff] }
  0xda   :  { %904 = vmatpush.msrb.mxu3 %v785_v19  ;;  %v130_v19 = vld [vmem:[%s3089_s0 + $0x370] sm:$0xff] }
  0xdb   :  { %597 = vmatmul.f32.gmra.mxu2 %v94_v22 }
  0xde   :  { %v2384_v25 = vpop.f32.mrf.mxu0  ;;  %v2386_v26 = vpop.f32.mrf.mxu1 }
  0xdf   :  { %v2394_v29 = vpop.f32.mrf.mxu2 }
  0xe1   :  { %478 = vmatmul.f32.gmra.mxu1 %v85_v27  ;;  %1651 = vmatmul.msk.f32.gmra.mxu0 %vm204_vm0, %v43_v28  ;;  %v118_v28 = vld [vmem:[%s3089_s0 + $0x310] sm:$0xff] }
  0xe3   :  { %600 = vmatmul.f32.gmra.mxu2 %v98_v30  ;;  %v143_v30 = vld [vmem:[%s3089_s0 + $0x3d8] sm:$0xff] }
  0xe4   :  { %1676 = vmatmul.msk.f32.gmra.mxu3 %vm204_vm0, %v143_v30  ;;  %v79_v30 = vld [vmem:[%s3089_s0 + $0x1d8] sm:$0xff] }
  0xe6   :  { %v2404_v32 = vpop.f32.mrf.mxu0  ;;  %v2406_v33 = vpop.f32.mrf.mxu1 }
  0xe7   :  { %v2414_v38 = vpop.f32.mrf.mxu2 }
  0xe9   :  { %481 = vmatmul.f32.gmra.mxu1 %v89_v34  ;;  %1652 = vmatmul.msk.f32.gmra.mxu0 %vm204_vm0, %v47_v35  ;;  %v109_v35 = vld [vmem:[%s3089_s0 + $0x2c8] sm:$0xff] }
  0xeb   :  { %603 = vmatmul.f32.gmra.mxu2 %v102_v39  ;;  %v67_v39 = vld [vmem:[%s3089_s0 + $0x178] sm:$0xff] }
  0xee   :  { %v2424_v43 = vpop.f32.mrf.mxu0  ;;  %v2426_v44 = vpop.f32.mrf.mxu1 }
  0xef   :  { %v2434_v50 = vpop.f32.mrf.mxu2 }
  0xf1   :  { %484 = vmatmul.f32.gmra.mxu1 %v93_v46  ;;  %1653 = vmatmul.msk.f32.gmra.mxu0 %vm204_vm0, %v51_v49  ;;  %v122_v46 = vld [vmem:[%s3089_s0 + $0x330] sm:$0xff]  ;;  %v147_v49 = vld [vmem:[%s3089_s0 + $0x3f8] sm:$0xff] }
  0xf2   :  { %1677 = vmatmul.msk.f32.gmra.mxu3 %vm204_vm0, %v147_v49 }
  0xf3   :  { %606 = vmatmul.f32.gmra.mxu2 %v106_v55 }
  0xf6   :  { %v2447_v58 = vpop.f32.mrf.mxu0  ;;  %v2449_v61 = vpop.f32.mrf.mxu1 }
  0xf7   :  { %v2457_v1 = vpop.f32.mrf.mxu2 }
  0xf9   :  { %487 = vmatmul.f32.gmra.mxu1 %v97_v62  ;;  %1654 = vmatmul.msk.f32.gmra.mxu0 %vm204_vm0, %v55_v0  ;;  %v71_v62 = vld [vmem:[%s3089_s0 + $0x198] sm:$0xff] }
  0xfb   :  { %609 = vmatmul.f32.gmra.mxu2 %v110_v2  ;;  %v126_v2 = vld [vmem:[%s3089_s0 + $0x350] sm:$0xff] }
  0xfe   :  { %v2467_v6 = vpop.f32.mrf.mxu0  ;;  %v2469_v8 = vpop.f32.mrf.mxu1 }
  0xff   :  { %v2477_v13 = vpop.f32.mrf.mxu2 }
 0x101   :  { %490 = vmatmul.f32.gmra.mxu1 %v101_v9  ;;  %1655 = vmatmul.msk.f32.gmra.mxu0 %vm204_vm0, %v59_v12  ;;  %v117_v12 = vld [vmem:[%s3089_s0 + $0x308] sm:$0xff] }
 0x103   :  { %612 = vmatmul.f32.gmra.mxu2 %v114_v15  ;;  %v75_v15 = vld [vmem:[%s3089_s0 + $0x1b8] sm:$0xff] }
 0x106   :  { %v2490_v20 = vpop.f32.mrf.mxu0  ;;  %v2492_v22 = vpop.f32.mrf.mxu1 }
 0x107   :  { %v2500_v27 = vpop.f32.mrf.mxu2 }
 0x109   :  { %493 = vmatmul.f32.gmra.mxu1 %v105_v23  ;;  %1656 = vmatmul.msk.f32.gmra.mxu0 %vm204_vm0, %v63_v24 }
 0x10b   :  { %615 = vmatmul.f32.gmra.mxu2 %v118_v28  ;;  %v121_v28 = vld [vmem:[%s3089_s0 + $0x328] sm:$0xff] }
 0x10e   :  { %v2510_v31 = vpop.f32.mrf.mxu0  ;;  %v2512_v34 = vpop.f32.mrf.mxu1 }
 0x10f   :  { %v2520_v40 = vpop.f32.mrf.mxu2 }
 0x111   :  { %496 = vmatmul.f32.gmra.mxu1 %v109_v35  ;;  %1657 = vmatmul.msk.f32.gmra.mxu0 %vm204_vm0, %v67_v39  ;;  %v134_v39 = vld [vmem:[%s3089_s0 + $0x390] sm:$0xff] }
 0x113   :  { %618 = vmatmul.f32.gmra.mxu2 %v122_v46  ;;  %v2581_v46 = vld [vmem:[%s3088_s2] ss:$0 sm:$0xff] }
 0x116   :  { %v2530_v52 = vpop.f32.mrf.mxu0  ;;  %v2532_v55 = vpop.f32.mrf.mxu1 }
 0x117   :  { %v2540_v0 = vpop.f32.mrf.mxu2 }
 0x119   :  { %499 = vmatmul.f32.gmra.mxu1 %v113_v56  ;;  %1658 = vmatmul.msk.f32.gmra.mxu0 %vm204_vm0, %v71_v62  ;;  %v125_v62 = vld [vmem:[%s3089_s0 + $0x348] sm:$0xff] }
 0x11b   :  { %621 = vmatmul.f32.gmra.mxu2 %v126_v2  ;;  %v83_v2 = vld [vmem:[%s3089_s0 + $0x1f8] sm:$0xff] }
 0x11e   :  { %v2546_v5 = vpop.f32.mrf.mxu0  ;;  %v2548_v9 = vpop.f32.mrf.mxu1 }
 0x11f   :  { %v2556_v16 = vpop.f32.mrf.mxu2 }
 0x121   :  { %502 = vmatmul.f32.gmra.mxu1 %v117_v12  ;;  %1659 = vmatmul.msk.f32.gmra.mxu0 %vm204_vm0, %v75_v15  ;;  %v319_v12 = vadd.f32 %v2581_v46, %v2239_v36  ;;  %v129_v36 = vld [vmem:[%s3089_s0 + $0x368] sm:$0xff] }
 0x123   :  { %624 = vmatmul.f32.gmra.mxu2 %v130_v19  ;;  %v138_v19 = vld [vmem:[%s3089_s0 + $0x3b0] sm:$0xff] }
 0x126   :  { %v2562_v23 = vpop.f32.mrf.mxu0  ;;  %v2564_v24 = vpop.f32.mrf.mxu1 }
 0x127   :  { %v2572_v35 = vpop.f32.mrf.mxu2 }
 0x129   :  { %505 = vmatmul.f32.gmra.mxu1 %v121_v28  ;;  %1660 = vmatmul.msk.f32.gmra.mxu0 %vm204_vm0, %v79_v30  ;;  %v432_v28 = vadd.f32 %v2386_v26, %v319_v12  ;;  %v322_v26 = vadd.f32 %v2581_v46, %v2252_v41 }
 0x12b   :  { %627 = vmatmul.f32.gmra.mxu2 %v134_v39  ;;  %v545_v30 = vadd.f32 %v2351_v14, %v432_v28  ;;  %v142_v14 = vld [vmem:[%s3089_s0 + $0x3d0] sm:$0xff] }
 0x12e   :  { %v2583_v49 = vpop.f32.mrf.mxu0  ;;  %v2585_v56 = vpop.f32.mrf.mxu1 }
 0x12f   :  { %v2595_v15 = vpop.f32.mrf.mxu2 }
 0x131   :  { %508 = vmatmul.f32.gmra.mxu1 %v125_v62  ;;  %1661 = vmatmul.msk.f32.gmra.mxu0 %vm204_vm0, %v83_v2  ;;  %v435_v2 = vadd.f32 %v2406_v33, %v322_v26  ;;  %v91_v33 = vld [vmem:[%s3089_s0 + $0x238] sm:$0xff] }
 0x133   :  { %630 = vmatmul.f32.gmra.mxu2 %v138_v19  ;;  %v548_v28 = vadd.f32 %v2371_v21, %v435_v2  ;;  %v146_v21 = vld [vmem:[%s3089_s0 + $0x3f0] sm:$0xff] }
 0x136   :  { %v2603_v39 = vpop.f32.mrf.mxu1  ;;  %v657_v63 = vpop.f32.mrf.mxu0 }
 0x137   :  { %v658_v62 = vadd.f32 %v657_v63, %v545_v30  ;;  %v2613_v12 = vpop.f32.mrf.mxu2  ;;  %v133_v63 = vld [vmem:[%s3089_s0 + $0x388] sm:$0xff]  ;;  %v325_v30 = vadd.f32 %v2581_v46, %v2267_v47 }
 0x139   :  { %v753_v19 = vmax.f32 %v658_v62, 0.0  ;;  %511 = vmatmul.f32.gmra.mxu1 %v129_v36  ;;  %1662 = vmatmul.msk.f32.gmra.mxu0 %vm204_vm0, %v87_v57  ;;  %v438_v26 = vadd.f32 %v2426_v44, %v325_v30  ;;  %v95_v44 = vld [vmem:[%s3089_s0 + $0x258] sm:$0xff] }
 0x13b   :  { %1678 = vmatmul.msk.f32.vlgmr.msrb.gmra.mxu3 %vm204_vm0, %v753_v19  ;;  %633 = vmatmul.f32.gmra.mxu2 %v142_v14  ;;  %v551_v14 = vadd.f32 %v2394_v29, %v438_v26  ;;  %v137_v19 = vld [vmem:[%s3089_s0 + $0x3a8] sm:$0xff]  ;;  %v99_v26 = vld [vmem:[%s3089_s0 + $0x278] sm:$0xff] }
 0x13e   :  { %v2622_v51 = vpop.f32.mrf.mxu1  ;;  %v660_v41 = vpop.f32.mrf.mxu0 }
 0x13f   :  { %v661_v57 = vadd.f32 %v660_v41, %v548_v28  ;;  %v2632_v36 = vpop.f32.mrf.mxu2  ;;  %v328_v28 = vadd.f32 %v2581_v46, %v2282_v53  ;;  %v141_v53 = vld [vmem:[%s3089_s0 + $0x3c8] sm:$0xff] }
 0x141   :  { %v754_v62 = vmax.f32 %v661_v57, 0.0  ;;  %514 = vmatmul.f32.gmra.mxu1 %v133_v63  ;;  %1663 = vmatmul.msk.f32.gmra.mxu0 %vm204_vm0, %v91_v33  ;;  %v441_v33 = vadd.f32 %v2449_v61, %v328_v28  ;;  %v331_v61 = vadd.f32 %v2581_v46, %v2298_v59  ;;  %v145_v59 = vld [vmem:[%s3089_s0 + $0x3e8] sm:$0xff] }
 0x143   :  { %1679 = vmatmul.msk.f32.gmra.mxu3 %vm204_vm0, %v754_v62  ;;  %636 = vmatmul.f32.gmra.mxu2 %v146_v21  ;;  %v554_v30 = vadd.f32 %v2414_v38, %v441_v33  ;;  %v334_v33 = vadd.f32 %v2581_v46, %v2321_v3  ;;  %v337_v3 = vadd.f32 %v2581_v46, %v2341_v10 }
 0x146   :  { %v2641_v2 = vpop.f32.mrf.mxu1  ;;  %v663_v47 = vpop.f32.mrf.mxu0 }
 0x147   :  { %v664_v41 = vadd.f32 %v663_v47, %v551_v14  ;;  %v2651_v63 = vpop.f32.mrf.mxu2  ;;  %v444_v47 = vadd.f32 %v2469_v8, %v331_v61  ;;  %v103_v8 = vld [vmem:[%s3089_s0 + $0x298] sm:$0xff] }
 0x149   :  { %v755_v29 = vmax.f32 %v664_v41, 0.0  ;;  %517 = vmatmul.f32.gmra.mxu1 %v137_v19  ;;  %1664 = vmatmul.msk.f32.gmra.mxu0 %vm204_vm0, %v95_v44  ;;  %v2671_v19 = vpop.f32.mrf.mxu3  ;;  %v557_v44 = vadd.f32 %v2434_v50, %v444_v47 }
 0x14b   :  { %1680 = vmatmul.msk.f32.gmra.mxu3 %vm204_vm0, %v755_v29 }
 0x14e   :  { %v2657_v57 = vpop.f32.mrf.mxu1  ;;  %v666_v21 = vpop.f32.mrf.mxu0 }
 0x14f   :  { %v667_v62 = vadd.f32 %v666_v21, %v554_v30  ;;  %v2667_v14 = vpop.f32.mrf.mxu2  ;;  %v447_v21 = vadd.f32 %v2492_v22, %v334_v33  ;;  %v450_v22 = vadd.f32 %v2512_v34, %v337_v3  ;;  %v340_v33 = vadd.f32 %v2581_v46, %v2361_v17 }
 0x151   :  { %v756_v38 = vmax.f32 %v667_v62, 0.0  ;;  %520 = vmatmul.f32.gmra.mxu1 %v141_v53  ;;  %1665 = vmatmul.msk.f32.gmra.mxu0 %vm204_vm0, %v99_v26  ;;  %v2690_v53 = vpop.f32.mrf.mxu3  ;;  %v560_v26 = vadd.f32 %v2457_v1, %v447_v21  ;;  %v453_v21 = vadd.f32 %v2532_v55, %v340_v33 }
 0x153   :  { %1681 = vmatmul.msk.f32.gmra.mxu3 %vm204_vm0, %v756_v38  ;;  %v566_v34 = vadd.f32 %v2500_v27, %v453_v21 }
 0x156   :  { %v2675_v28 = vpop.f32.mrf.mxu1  ;;  %v669_v41 = vpop.f32.mrf.mxu0 }
 0x157   :  { %v670_v29 = vadd.f32 %v669_v41, %v557_v44  ;;  %v2685_v30 = vpop.f32.mrf.mxu2  ;;  %v563_v41 = vadd.f32 %v2477_v13, %v450_v22 }
 0x159   :  { %v757_v50 = vmax.f32 %v670_v29, 0.0  ;;  %523 = vmatmul.f32.gmra.mxu1 %v145_v59  ;;  %1666 = vmatmul.msk.f32.gmra.mxu0 %vm204_vm0, %v103_v8  ;;  %v2702_v59 = vpop.f32.mrf.mxu3 }
 0x15b   :  { %1682 = vmatmul.msk.f32.gmra.mxu3 %vm204_vm0, %v757_v50 }
 0x15e   :  { %v2693_v61 = vpop.f32.mrf.mxu1  ;;  %v672_v62 = vpop.f32.mrf.mxu0 }
 0x15f   :  { %v673_v47 = vadd.f32 %v672_v62, %v560_v26  ;;  %v2697_v38 = vpop.f32.mrf.mxu2  ;;  %v343_v62 = vadd.f32 %v2581_v46, %v2384_v25 }
 0x161   :  { %v758_v44 = vmax.f32 %v673_v47, 0.0  ;;  %v2717_v47 = vpop.f32.mrf.mxu3  ;;  %v456_v22 = vadd.f32 %v2548_v9, %v343_v62 }
 0x163   :  { %1683 = vmatmul.msk.f32.gmra.mxu3 %vm204_vm0, %v758_v44  ;;  %v569_v55 = vadd.f32 %v2520_v40, %v456_v22 }
 0x166   :  { %v2704_v8 = vpop.f32.mrf.mxu1  ;;  %v675_v1 = vpop.f32.mrf.mxu0 }
 0x167   :  { %v676_v29 = vadd.f32 %v675_v1, %v563_v41  ;;  %v2708_v10 = vpop.f32.mrf.mxu2  ;;  %v346_v1 = vadd.f32 %v2581_v46, %v2404_v32 }
 0x169   :  { %v759_v50 = vmax.f32 %v676_v29, 0.0  ;;  %v459_v29 = vadd.f32 %v2564_v24, %v346_v1 }
 0x16b   :  { %1684 = vmatmul.msk.f32.gmra.mxu3 %vm204_vm0, %v759_v50  ;;  %v2731_v50 = vpop.f32.mrf.mxu3  ;;  %v572_v9 = vadd.f32 %v2540_v0, %v459_v29 }
 0x16e   :  { %v2713_v26 = vpop.f32.mrf.mxu1  ;;  %v678_v13 = vpop.f32.mrf.mxu0 }
 0x16f   :  { %v679_v3 = vadd.f32 %v678_v13, %v566_v34  ;;  %v2719_v17 = vpop.f32.mrf.mxu2  ;;  %v349_v13 = vadd.f32 %v2581_v46, %v2424_v43 }
 0x171   :  { %v760_v44 = vmax.f32 %v679_v3, 0.0  ;;  %v462_v3 = vadd.f32 %v2585_v56, %v349_v13 }
 0x173   :  { %1685 = vmatmul.msk.f32.gmra.mxu3 %vm204_vm0, %v760_v44  ;;  %v2743_v24 = vpop.f32.mrf.mxu3  ;;  %v575_v44 = vadd.f32 %v2556_v16, %v462_v3 }
 0x176   :  { %v2724_v41 = vpop.f32.mrf.mxu1  ;;  %v681_v27 = vpop.f32.mrf.mxu0 }
 0x177   :  { %v682_v33 = vadd.f32 %v681_v27, %v569_v55  ;;  %v2728_v25 = vpop.f32.mrf.mxu2  ;;  %v352_v27 = vadd.f32 %v2581_v46, %v2447_v58 }
 0x179   :  { %v761_v21 = vmax.f32 %v682_v33, 0.0  ;;  %v465_v33 = vadd.f32 %v2603_v39, %v352_v27 }
 0x17b   :  { %1686 = vmatmul.msk.f32.gmra.mxu3 %vm204_vm0, %v761_v21  ;;  %v578_v56 = vadd.f32 %v2572_v35, %v465_v33  ;;  %v2755_v21 = vpop.f32.mrf.mxu3 }
 0x17e   :  { %v2735_v34 = vpop.f32.mrf.mxu1  ;;  %v684_v40 = vpop.f32.mrf.mxu0 }
 0x17f   :  { %v685_v62 = vadd.f32 %v684_v40, %v572_v9  ;;  %v2739_v32 = vpop.f32.mrf.mxu2  ;;  %v355_v40 = vadd.f32 %v2581_v46, %v2467_v6 }
 0x181   :  { %v762_v22 = vmax.f32 %v685_v62, 0.0  ;;  %v468_v62 = vadd.f32 %v2622_v51, %v355_v40 }
 0x183   :  { %1687 = vmatmul.msk.f32.gmra.mxu3 %vm204_vm0, %v762_v22  ;;  %v581_v39 = vadd.f32 %v2595_v15, %v468_v62  ;;  %v2770_v27 = vpop.f32.mrf.mxu3 }
 0x186   :  { %v2746_v55 = vpop.f32.mrf.mxu1  ;;  %v687_v0 = vpop.f32.mrf.mxu0 }
 0x187   :  { %v688_v1 = vadd.f32 %v687_v0, %v575_v44  ;;  %v2750_v43 = vpop.f32.mrf.mxu2  ;;  %v358_v44 = vadd.f32 %v2581_v46, %v2490_v20 }
 0x189   :  { %v763_v29 = vmax.f32 %v688_v1, 0.0  ;;  %v471_v6 = vadd.f32 %v2641_v2, %v358_v44 }
 0x18b   :  { %1688 = vmatmul.msk.f32.gmra.mxu3 %vm204_vm0, %v763_v29  ;;  %v584_v51 = vadd.f32 %v2613_v12, %v471_v6 }
 0x18e   :  { %v2757_v9 = vpop.f32.mrf.mxu1  ;;  %v690_v16 = vpop.f32.mrf.mxu0 }
 0x18f   :  { %v691_v13 = vadd.f32 %v690_v16, %v578_v56  ;;  %v2761_v58 = vpop.f32.mrf.mxu2  ;;  %v361_v56 = vadd.f32 %v2581_v46, %v2510_v31 }
 0x191   :  { %v764_v3 = vmax.f32 %v691_v13, 0.0  ;;  %v474_v20 = vadd.f32 %v2657_v57, %v361_v56  ;;  %v2782_v13 = vpop.f32.mrf.mxu3 }
 0x193   :  { %1689 = vmatmul.msk.f32.gmra.mxu3 %vm204_vm0, %v764_v3  ;;  %v587_v62 = vadd.f32 %v2632_v36, %v474_v20 }
 0x196   :  { %v2766_v22 = vpop.f32.mrf.mxu1  ;;  %v693_v35 = vpop.f32.mrf.mxu0 }
 0x197   :  { %v694_v0 = vadd.f32 %v693_v35, %v581_v39  ;;  %v2773_v33 = vpop.f32.mrf.mxu2  ;;  %v364_v39 = vadd.f32 %v2581_v46, %v2530_v52 }
 0x199   :  { %v765_v1 = vmax.f32 %v694_v0, 0.0  ;;  %v477_v31 = vadd.f32 %v2675_v28, %v364_v39  ;;  %v2794_v57 = vpop.f32.mrf.mxu3 }
 0x19b   :  { %1690 = vmatmul.msk.f32.gmra.mxu3 %vm204_vm0, %v765_v1  ;;  %v590_v0 = vadd.f32 %v2651_v63, %v477_v31 }
 0x19e   :  { %v2777_v29 = vpop.f32.mrf.mxu1  ;;  %v696_v15 = vpop.f32.mrf.mxu0 }
 0x19f   :  { %v697_v16 = vadd.f32 %v696_v15, %v584_v51  ;;  %v2785_v2 = vpop.f32.mrf.mxu2  ;;  %v367_v51 = vadd.f32 %v2581_v46, %v2546_v5 }
 0x1a1   :  { %v766_v40 = vmax.f32 %v697_v16, 0.0  ;;  %v480_v52 = vadd.f32 %v2693_v61, %v367_v51  ;;  %v2806_v16 = vpop.f32.mrf.mxu3 }
 0x1a3   :  { %1691 = vmatmul.msk.f32.gmra.mxu3 %vm204_vm0, %v766_v40  ;;  %v593_v28 = vadd.f32 %v2667_v14, %v480_v52  ;;  %v370_v40 = vadd.f32 %v2581_v46, %v2562_v23  ;;  %v2819_v14 = vld [vmem:[%s3091_s4] ss:$0 sm:$0xff]  ;;  %v373_v23 = vadd.f32 %v2581_v46, %v2583_v49  ;;  %v376_v49 = vadd.f32 %v2581_v46, %v2241_v37 }
 0x1a5   :  { %v483_v5 = vadd.f32 %v2704_v8, %v370_v40 }
 0x1a6   :  { %v2788_v3 = vpop.f32.mrf.mxu1  ;;  %v699_v12 = vpop.f32.mrf.mxu0 }
 0x1a7   :  { %v700_v35 = vadd.f32 %v699_v12, %v587_v62  ;;  %v2797_v6 = vpop.f32.mrf.mxu2  ;;  %v596_v61 = vadd.f32 %v2685_v30, %v483_v5 }
 0x1a9   :  { %v767_v44 = vmax.f32 %v700_v35, 0.0 }
 0x1ab   :  { %1692 = vmatmul.msk.f32.gmra.mxu3 %vm204_vm0, %v767_v44 }
 0x1ae   :  { %v2799_v1 = vpop.f32.mrf.mxu1  ;;  %v702_v36 = vpop.f32.mrf.mxu0 }
 0x1af   :  { %v703_v15 = vadd.f32 %v702_v36, %v590_v0  ;;  %v2812_v12 = vpop.f32.mrf.mxu2  ;;  %v486_v36 = vadd.f32 %v2713_v26, %v373_v23  ;;  %v489_v26 = vadd.f32 %v2724_v41, %v376_v49 }
 0x1b1   :  { %v768_v56 = vmax.f32 %v703_v15, 0.0  ;;  %v599_v30 = vadd.f32 %v2697_v38, %v486_v36  ;;  %v602_v38 = vadd.f32 %v2708_v10, %v489_v26  ;;  %v382_v10 = vadd.f32 %v2581_v46, %v2269_v48 }
 0x1b3   :  { %1693 = vmatmul.msk.f32.gmra.mxu3 %vm204_vm0, %v768_v56 }
 0x1b6   :  { %v2808_v20 = vpop.f32.mrf.mxu1  ;;  %v705_v63 = vpop.f32.mrf.mxu0 }
 0x1b7   :  { %v706_v62 = vadd.f32 %v705_v63, %v593_v28  ;;  %v2828_v15 = vpop.f32.mrf.mxu2 }
 0x1b9   :  { %v769_v39 = vmax.f32 %v706_v62, 0.0 }
 0x1bb   :  { %1694 = vmatmul.msk.f32.gmra.mxu3 %vm204_vm0, %v769_v39 }
 0x1be   :  { %v2822_v35 = vpop.f32.mrf.mxu1  ;;  %v708_v31 = vpop.f32.mrf.mxu0 }
 0x1bf   :  { %v709_v44 = vadd.f32 %v708_v31, %v596_v61  ;;  %v906_v0 = vpop.f32.mrf.mxu3  ;;  %v2839_v23 = vpop.f32.mrf.mxu2 }
 0x1c0   :  { %v907_v8 = vadd.f32 %v2819_v14, %v906_v0  ;;  %v379_v0 = vadd.f32 %v2581_v46, %v2254_v42  ;;  %v412_v42 = vadd.f32 %v2581_v46, %v2331_v7 }
 0x1c1   :  { %v770_v51 = vmax.f32 %v709_v44, 0.0 }
 0x1c2   :  { %v1710_v52 = vmul.f32 -1.442695, %v907_v8 }
 0x1c3   :  { %1695 = vmatmul.msk.f32.gmra.mxu3 %vm204_vm0, %v770_v51  ;;  %v492_v51 = vadd.f32 %v2735_v34, %v379_v0  ;;  %v495_v34 = vadd.f32 %v2746_v55, %v382_v10  ;;  %v385_v10 = vadd.f32 %v2581_v46, %v2284_v54 }
 0x1c4   :  { %1780 = vpow2.f32 %v1710_v52 }
 0x1c5   :  { %v608_v7 = vadd.f32 %v2728_v25, %v495_v34  ;;  %v498_v34 = vadd.f32 %v2757_v9, %v385_v10 }
 0x1c6   :  { %v2832_v56 = vpop.f32.mrf.mxu1  ;;  %v711_v28 = vpop.f32.mrf.mxu0 }
 0x1c7   :  { %v712_v63 = vadd.f32 %v711_v28, %v599_v30  ;;  %v909_v40 = vpop.f32.mrf.mxu3  ;;  %v637_v26 = vpop.f32.mrf.mxu2  ;;  %v611_v9 = vadd.f32 %v2739_v32, %v498_v34 }
 0x1c8   :  { %v910_v62 = vadd.f32 %v2819_v14, %v909_v40 }
 0x1c9   :  { %v771_v5 = vmax.f32 %v712_v63, 0.0  ;;  %v724_v32 = vadd.f32 %v2690_v53, %v611_v9 }
 0x1ca   :  { %v1781_v39 = vpop.eup %1780  ;;  %v1711_v61 = vmul.f32 -1.442695, %v910_v62  ;;  %v605_v62 = vadd.f32 %v2719_v17, %v492_v51 }
 0x1cb   :  { %v1098_v31 = vadd.f32 1.0, %v1781_v39  ;;  %1696 = vmatmul.msk.f32.gmra.mxu3 %vm204_vm0, %v771_v5 }
 0x1cc   :  { %1782 = vpow2.f32 %v1711_v61 }
 0x1cd   :  { %1784 = vrcp.f32 %v1098_v31  ;;  %v1141_v48 = vand.u32 2147483648, %v1098_v31  ;;  %vm1135_vm2 = vweird.f32 %v1098_v31 }
 0x1ce   :  { %v2842_v44 = vpop.f32.mrf.mxu1  ;;  %v714_v37 = vpop.f32.mrf.mxu0 }
 0x1cf   :  { %v715_v8 = vadd.f32 %v714_v37, %v602_v38  ;;  %v912_v41 = vpop.f32.mrf.mxu3 }
 0x1d0   :  { %v913_v36 = vadd.f32 %v2819_v14, %v912_v41  ;;  %v1139_v41 = vand.u32 2147483647, %v1098_v31 }
 0x1d1   :  { %v772_v52 = vmax.f32 %v715_v8, 0.0 }
 0x1d2   :  { %v1783_v30 = vpop.eup %1782  ;;  %v1712_v28 = vmul.f32 -1.442695, %v913_v36  ;;  %vm1140_vm4 = vcmp.eq.f32.partialorder %v1139_v41, 8.507059e+37  ;;  %v388_v41 = vadd.f32 %v2581_v46, %v2300_v60 }
 0x1d3   :  { %v1785_v49 = vpop.eup %1784  ;;  %v2850_v63 = vadd.f32 1.0, %v1783_v30  ;;  %1697 = vmatmul.msk.f32.gmra.mxu3 %vm204_vm0, %v772_v52 }
 0x1d4   :  { %v1131_v40 = vmul.f32 %v1785_v49, %v1098_v31  ;;  %1786 = vpow2.f32 %v1712_v28  ;;  %vm1136_vm1 = vweird.f32 %v1785_v49  ;;  %v721_v31 = vadd.f32 %v2671_v19, %v608_v7 }
 0x1d5   :  { %1788 = vrcp.f32 %v2850_v63  ;;  %vm1137_vm3 = vmor %vm1135_vm2, %vm1136_vm1  ;;  %vm1150_vm6 = vweird.f32 %v2850_v63 }
 0x1d6   :  { %v1132_v5 = vsub.f32 1.0, %v1131_v40  ;;  %v524_v39 = vpop.f32.mrf.mxu1  ;;  %v717_v61 = vpop.f32.mrf.mxu0  ;;  %v1142_v40 = vor.u32 1.1754944e-38, %v1141_v48  ;;  %v774_v19 = vmax.f32 %v721_v31, 0.0 }
 0x1d7   :  { %v525_v38 = vadd.f32 %v524_v39, %v412_v42  ;;  %v718_v37 = vadd.f32 %v717_v61, %v605_v62  ;;  %v915_v0 = vpop.f32.mrf.mxu3  ;;  %v1154_v61 = vand.u32 2147483647, %v2850_v63 }
 0x1d8   :  { %v1133_v8 = vmul.f32 %v1785_v49, %v1132_v5  ;;  %v916_v36 = vadd.f32 %v2819_v14, %v915_v0 }
 0x1d9   :  { %v773_v17 = vmax.f32 %v718_v37, 0.0  ;;  %v638_v51 = vadd.f32 %v637_v26, %v525_v38  ;;  %vm1155_vm8 = vcmp.eq.f32.partialorder %v1154_v61, 8.507059e+37 }
 0x1da   :  { %v1787_v55 = vpop.eup %1786  ;;  %v1134_v52 = vadd.f32 %v1785_v49, %v1133_v8  ;;  %v1713_v30 = vmul.f32 -1.442695, %v916_v36 }
 0x1db   :  { %v1789_v28 = vpop.eup %1788  ;;  %v1100_v42 = vadd.f32 1.0, %v1787_v55  ;;  %v2863_v62 = vadd.f32 %v2806_v16, %v638_v51  ;;  %1698 = vmatmul.msk.f32.gmra.mxu3 %vm204_vm0, %v773_v17  ;;  %v1156_v16 = vand.u32 2147483648, %v2850_v63  ;;  %v501_v55 = vadd.f32 %v2766_v22, %v388_v41 }
 0x1dc   :  { %v1138_v5 = vsel %vm1137_vm3, %v1785_v49, %v1134_v52  ;;  %v1146_v25 = vmul.f32 %v1789_v28, %v2850_v63  ;;  %1790 = vpow2.f32 %v1713_v30  ;;  %vm1151_vm5 = vweird.f32 %v1789_v28 }
 0x1dd   :  { %v1143_v26 = vsel %vm1140_vm4, %v1142_v40, %v1138_v5  ;;  %1792 = vrcp.f32 %v1100_v42  ;;  %vm1152_vm7 = vmor %vm1150_vm6, %vm1151_vm5  ;;  %v1157_v36 = vor.u32 1.1754944e-38, %v1156_v16  ;;  %v1171_v63 = vand.u32 2147483648, %v1100_v42 }
 0x1de   :  { %1610 = vst.msk [vmem:[%s3092_s5] sm:$0xff] %vm204_vm0, %v1143_v26  ;;  %v1147_v54 = vsub.f32 1.0, %v1146_v25  ;;  %v775_v5 = vmax.f32 %v724_v32, 0.0  ;;  %v614_v53 = vadd.f32 %v2750_v43, %v501_v55  ;;  %vm1165_vm10 = vweird.f32 %v1100_v42 }
 0x1df   :  { %v918_v39 = vpop.f32.mrf.mxu3  ;;  %v391_v26 = vadd.f32 %v2581_v46, %v2323_v4 }
 0x1e0   :  { %v1148_v49 = vmul.f32 %v1789_v28, %v1147_v54  ;;  %v919_v48 = vadd.f32 %v2819_v14, %v918_v39  ;;  %v1172_v54 = vor.u32 1.1754944e-38, %v1171_v63  ;;  %v727_v61 = vadd.f32 %v2702_v59, %v614_v53 }
 0x1e1   :  { %v504_v43 = vadd.f32 %v2777_v29, %v391_v26 }
 0x1e2   :  { %v1791_v38 = vpop.eup %1790  ;;  %v1149_v37 = vadd.f32 %v1789_v28, %v1148_v49  ;;  %v1714_v0 = vmul.f32 -1.442695, %v919_v48 }
 0x1e3   :  { %v1793_v8 = vpop.eup %1792  ;;  %v1101_v7 = vadd.f32 1.0, %v1791_v38  ;;  %1699 = vmatmul.msk.f32.gmra.mxu3 %vm204_vm0, %v774_v19  ;;  %v617_v59 = vadd.f32 %v2761_v58, %v504_v43 }
 0x1e4   :  { %v1153_v17 = vsel %vm1152_vm7, %v1789_v28, %v1149_v37  ;;  %v1161_v51 = vmul.f32 %v1793_v8, %v1100_v42  ;;  %1794 = vpow2.f32 %v1714_v0  ;;  %vm1166_vm9 = vweird.f32 %v1793_v8 }
 0x1e5   :  { %v1158_v52 = vsel %vm1155_vm8, %v1157_v36, %v1153_v17  ;;  %1796 = vrcp.f32 %v1101_v7  ;;  %v1169_v28 = vand.u32 2147483647, %v1100_v42  ;;  %vm1167_vm11 = vmor %vm1165_vm10, %vm1166_vm9  ;;  %v1186_v42 = vand.u32 2147483648, %v1101_v7 }
 0x1e6   :  { %1611 = vst.msk [vmem:[%s3092_s5 + $0x8] sm:$0xff] %vm204_vm0, %v1158_v52  ;;  %v1162_v60 = vsub.f32 1.0, %v1161_v51  ;;  %v1184_v38 = vand.u32 2147483647, %v1101_v7  ;;  %v776_v0 = vmax.f32 %v727_v61, 0.0  ;;  %vm1180_vm14 = vweird.f32 %v1101_v7 }
 0x1e7   :  { %v921_v30 = vpop.f32.mrf.mxu3  ;;  %vm1170_vm12 = vcmp.eq.f32.partialorder %v1169_v28, 8.507059e+37  ;;  %v394_v17 = vadd.f32 %v2581_v46, %v2343_v11  ;;  %v1187_v51 = vor.u32 1.1754944e-38, %v1186_v42 }
 0x1e8   :  { %v1163_v10 = vmul.f32 %v1793_v8, %v1162_v60  ;;  %v922_v40 = vadd.f32 %v2819_v14, %v921_v30  ;;  %vm1185_vm1 = vcmp.eq.f32.partialorder %v1184_v38, 8.507059e+37  ;;  %v730_v60 = vadd.f32 %v2717_v47, %v617_v59 }
 0x1e9   :  { %v507_v58 = vadd.f32 %v2788_v3, %v394_v17 }
 0x1ea   :  { %v1795_v25 = vpop.eup %1794  ;;  %v1164_v22 = vadd.f32 %v1793_v8, %v1163_v10  ;;  %v1715_v31 = vmul.f32 -1.442695, %v922_v40 }
 0x1eb   :  { %v1797_v34 = vpop.eup %1796  ;;  %v1102_v16 = vadd.f32 1.0, %v1795_v25  ;;  %1700 = vmatmul.msk.f32.gmra.mxu3 %vm204_vm0, %v775_v5  ;;  %v777_v5 = vmax.f32 %v730_v60, 0.0  ;;  %v620_v47 = vadd.f32 %v2773_v33, %v507_v58 }
 0x1ec   :  { %v1168_v39 = vsel %vm1167_vm11, %v1793_v8, %v1164_v22  ;;  %v1176_v49 = vmul.f32 %v1797_v34, %v1101_v7  ;;  %1798 = vpow2.f32 %v1715_v31  ;;  %vm1181_vm13 = vweird.f32 %v1797_v34 }
 0x1ed   :  { %v1173_v48 = vsel %vm1170_vm12, %v1172_v54, %v1168_v39  ;;  %1800 = vrcp.f32 %v1102_v16  ;;  %vm1182_vm15 = vmor %vm1180_vm14, %vm1181_vm13  ;;  %v1201_v7 = vand.u32 2147483648, %v1102_v16  ;;  %v1199_v28 = vand.u32 2147483647, %v1102_v16 }
 0x1ee   :  { %1612 = vst.msk [vmem:[%s3092_s5 + $0x10] sm:$0xff] %vm204_vm0, %v1173_v48  ;;  %v1177_v4 = vsub.f32 1.0, %v1176_v49  ;;  %vm1195_vm3 = vweird.f32 %v1102_v16  ;;  %v397_v31 = vadd.f32 %v2581_v46, %v2363_v18  ;;  %v733_v49 = vadd.f32 %v2731_v50, %v620_v47 }
 0x1ef   :  { %v924_v19 = vpop.f32.mrf.mxu3  ;;  %vm1200_vm5 = vcmp.eq.f32.partialorder %v1199_v28, 8.507059e+37 }
 0x1f0   :  { %v1178_v9 = vmul.f32 %v1797_v34, %v1177_v4  ;;  %v925_v37 = vadd.f32 %v2819_v14, %v924_v19  ;;  %v510_v33 = vadd.f32 %v2799_v1, %v397_v31  ;;  %v778_v19 = vmax.f32 %v733_v49, 0.0 }
 0x1f2   :  { %v1799_v8 = vpop.eup %1798  ;;  %v1179_v29 = vadd.f32 %v1797_v34, %v1178_v9  ;;  %v1716_v41 = vmul.f32 -1.442695, %v925_v37  ;;  %v623_v50 = vadd.f32 %v2785_v2, %v510_v33 }
 0x1f3   :  { %v1801_v36 = vpop.eup %1800  ;;  %v1103_v32 = vadd.f32 1.0, %v1799_v8  ;;  %1701 = vmatmul.msk.f32.gmra.mxu3 %vm204_vm0, %v776_v0  ;;  %v400_v0 = vadd.f32 %v2581_v46, %v2262_v45 }
 0x1f4   :  { %v1183_v55 = vsel %vm1182_vm15, %v1797_v34, %v1179_v29  ;;  %v1191_v52 = vmul.f32 %v1801_v36, %v1102_v16  ;;  %1802 = vpow2.f32 %v1716_v41  ;;  %vm1196_vm2 = vweird.f32 %v1801_v36 }
 0x1f5   :  { %v1188_v63 = vsel %vm1185_vm1, %v1187_v51, %v1183_v55  ;;  %1804 = vrcp.f32 %v1103_v32  ;;  %vm1197_vm4 = vmor %vm1195_vm3, %vm1196_vm2  ;;  %v1202_v34 = vor.u32 1.1754944e-38, %v1201_v7  ;;  %v1216_v16 = vand.u32 2147483648, %v1103_v32 }
 0x1f6   :  { %1613 = vst.msk [vmem:[%s3092_s5 + $0x18] sm:$0xff] %vm204_vm0, %v1188_v63  ;;  %v1192_v11 = vsub.f32 1.0, %v1191_v52  ;;  %v1214_v4 = vand.u32 2147483647, %v1103_v32  ;;  %vm1210_vm7 = vweird.f32 %v1103_v32  ;;  %v513_v2 = vadd.f32 %v2808_v20, %v400_v0 }
 0x1f7   :  { %v927_v30 = vpop.f32.mrf.mxu3  ;;  %v1217_v59 = vor.u32 1.1754944e-38, %v1216_v16 }
 0x1f8   :  { %v1193_v10 = vmul.f32 %v1801_v36, %v1192_v11  ;;  %v928_v40 = vadd.f32 %v2819_v14, %v927_v30  ;;  %vm1215_vm9 = vcmp.eq.f32.partialorder %v1214_v4, 8.507059e+37  ;;  %v3096_v30 = vld [vmem:[#allocation2_spill] sm:$0xff] }
 0x1fa   :  { %v1803_v53 = vpop.eup %1802  ;;  %v1194_v3 = vadd.f32 %v1801_v36, %v1193_v10  ;;  %v1717_v25 = vmul.f32 -1.442695, %v928_v40  ;;  %v403_v10 = vadd.f32 %v2581_v46, %v3096_v30 }
 0x1fb   :  { %v1805_v22 = vpop.eup %1804  ;;  %v1104_v26 = vadd.f32 1.0, %v1803_v53  ;;  %1702 = vmatmul.msk.f32.gmra.mxu3 %vm204_vm0, %v777_v5 }
 0x1fc   :  { %v1198_v54 = vsel %vm1197_vm4, %v1801_v36, %v1194_v3  ;;  %v1206_v39 = vmul.f32 %v1805_v22, %v1103_v32  ;;  %1806 = vpow2.f32 %v1717_v25  ;;  %vm1211_vm6 = vweird.f32 %v1805_v22 }
 0x1fd   :  { %v1203_v61 = vsel %vm1200_vm5, %v1202_v34, %v1198_v54  ;;  %1808 = vrcp.f32 %v1104_v26  ;;  %vm1212_vm8 = vmor %vm1210_vm7, %vm1211_vm6  ;;  %v736_v36 = vadd.f32 %v2743_v24, %v623_v50  ;;  %v1231_v51 = vand.u32 2147483648, %v1104_v26 }
 0x1fe   :  { %1614 = vst.msk [vmem:[%s3092_s5 + $0x20] sm:$0xff] %vm204_vm0, %v1203_v61  ;;  %v1207_v18 = vsub.f32 1.0, %v1206_v39  ;;  %v1229_v52 = vand.u32 2147483647, %v1104_v26  ;;  %v626_v24 = vadd.f32 %v2797_v6, %v513_v2  ;;  %vm1225_vm11 = vweird.f32 %v1104_v26  ;;  %v3098_v2 = vld [vmem:[#allocation4_spill] sm:$0xff] }
 0x1ff   :  { %v930_v43 = vpop.f32.mrf.mxu3  ;;  %v779_v58 = vmax.f32 %v736_v36, 0.0  ;;  %v1232_v28 = vor.u32 1.1754944e-38, %v1231_v51  ;;  %v516_v6 = vadd.f32 %v2822_v35, %v403_v10 }
 0x200   :  { %v1208_v48 = vmul.f32 %v1805_v22, %v1207_v18  ;;  %v931_v42 = vadd.f32 %v2819_v14, %v930_v43  ;;  %vm1230_vm13 = vcmp.eq.f32.partialorder %v1229_v52, 8.507059e+37  ;;  %v739_v53 = vadd.f32 %v2755_v21, %v626_v24  ;;  %v3097_v18 = vld [vmem:[#allocation3_spill] sm:$0xff] }
 0x201   :  { %v629_v21 = vadd.f32 %v2812_v12, %v516_v6  ;;  %v406_v16 = vadd.f32 %v2581_v46, %v3097_v18 }
 0x202   :  { %v1807_v9 = vpop.eup %1806  ;;  %v1209_v1 = vadd.f32 %v1805_v22, %v1208_v48  ;;  %v1718_v38 = vmul.f32 -1.442695, %v931_v42  ;;  %v780_v39 = vmax.f32 %v739_v53, 0.0 }
 0x203   :  { %v1809_v37 = vpop.eup %1808  ;;  %v1105_v8 = vadd.f32 1.0, %v1807_v9  ;;  %1703 = vmatmul.msk.f32.gmra.mxu3 %vm204_vm0, %v778_v19  ;;  %v742_v19 = vadd.f32 %v2770_v27, %v629_v21  ;;  %v519_v12 = vadd.f32 %v2832_v56, %v406_v16 }
 0x204   :  { %v1213_v29 = vsel %vm1212_vm8, %v1805_v22, %v1209_v1  ;;  %v1221_v41 = vmul.f32 %v1809_v37, %v1104_v26  ;;  %1810 = vpow2.f32 %v1718_v38  ;;  %vm1226_vm10 = vweird.f32 %v1809_v37 }
 0x205   :  { %v1218_v17 = vsel %vm1215_vm9, %v1217_v59, %v1213_v29  ;;  %1812 = vrcp.f32 %v1105_v8  ;;  %vm1227_vm12 = vmor %vm1225_vm11, %vm1226_vm10  ;;  %v1246_v22 = vand.u32 2147483648, %v1105_v8  ;;  %v1244_v26 = vand.u32 2147483647, %v1105_v8 }
 0x206   :  { %1615 = vst.msk [vmem:[%s3092_s5 + $0x28] sm:$0xff] %vm204_vm0, %v1218_v17  ;;  %v1222_v45 = vsub.f32 1.0, %v1221_v41  ;;  %vm1240_vm15 = vweird.f32 %v1105_v8  ;;  %v632_v27 = vadd.f32 %v2828_v15, %v519_v12  ;;  %v409_v17 = vadd.f32 %v2581_v46, %v3098_v2 }
 0x207   :  { %v933_v32 = vpop.f32.mrf.mxu3  ;;  %v1247_v43 = vor.u32 1.1754944e-38, %v1246_v22  ;;  %vm1245_vm2 = vcmp.eq.f32.partialorder %v1244_v26, 8.507059e+37 }
 0x208   :  { %v1223_v55 = vmul.f32 %v1809_v37, %v1222_v45  ;;  %v934_v60 = vadd.f32 %v2819_v14, %v933_v32  ;;  %v745_v52 = vadd.f32 %v2782_v13, %v632_v27  ;;  %v522_v15 = vadd.f32 %v2842_v44, %v409_v17 }
 0x20a   :  { %v1811_v63 = vpop.eup %1810  ;;  %v1224_v20 = vadd.f32 %v1809_v37, %v1223_v55  ;;  %v1719_v11 = vmul.f32 -1.442695, %v934_v60  ;;  %v635_v13 = vadd.f32 %v2839_v23, %v522_v15 }
 0x20b   :  { %v1813_v7 = vpop.eup %1812  ;;  %v1106_v40 = vadd.f32 1.0, %v1811_v63  ;;  %1704 = vmatmul.msk.f32.gmra.mxu3 %vm204_vm0, %v779_v58 }
 0x20c   :  { %v1228_v5 = vsel %vm1227_vm12, %v1809_v37, %v1224_v20  ;;  %v1236_v47 = vmul.f32 %v1813_v7, %v1105_v8  ;;  %1814 = vpow2.f32 %v1719_v11  ;;  %vm1241_vm14 = vweird.f32 %v1813_v7 }
 0x20d   :  { %v1233_v3 = vsel %vm1230_vm13, %v1232_v28, %v1228_v5  ;;  %1816 = vrcp.f32 %v1106_v40  ;;  %vm1242_vm1 = vmor %vm1240_vm15, %vm1241_vm14  ;;  %v1261_v1 = vand.u32 2147483648, %v1106_v40  ;;  %v1259_v0 = vand.u32 2147483647, %v1106_v40 }
 0x20e   :  { %1616 = vst.msk [vmem:[%s3092_s5 + $0x30] sm:$0xff] %vm204_vm0, %v1233_v3  ;;  %v1237_v25 = vsub.f32 1.0, %v1236_v47  ;;  %v781_v8 = vmax.f32 %v742_v19, 0.0  ;;  %vm1255_vm4 = vweird.f32 %v1106_v40  ;;  %v748_v6 = vadd.f32 %v2794_v57, %v635_v13 }
 0x20f   :  { %v936_v31 = vpop.f32.mrf.mxu3  ;;  %v1262_v45 = vor.u32 1.1754944e-38, %v1261_v1  ;;  %vm1260_vm6 = vcmp.eq.f32.partialorder %v1259_v0, 8.507059e+37 }
 0x210   :  { %v1238_v34 = vmul.f32 %v1813_v7, %v1237_v25  ;;  %v937_v54 = vadd.f32 %v2819_v14, %v936_v31 }
 0x212   :  { %v1815_v49 = vpop.eup %1814  ;;  %v1239_v35 = vadd.f32 %v1813_v7, %v1238_v34  ;;  %v1720_v33 = vmul.f32 -1.442695, %v937_v54  ;;  %v783_v54 = vmax.f32 %v748_v6, 0.0 }
 0x213   :  { %v1817_v61 = vpop.eup %1816  ;;  %v1107_v48 = vadd.f32 1.0, %v1815_v49  ;;  %1705 = vmatmul.msk.f32.gmra.mxu3 %vm204_vm0, %v780_v39 }
 0x214   :  { %v1243_v4 = vsel %vm1242_vm1, %v1813_v7, %v1239_v35  ;;  %v1251_v42 = vmul.f32 %v1817_v61, %v1106_v40  ;;  %1818 = vpow2.f32 %v1720_v33  ;;  %vm1256_vm3 = vweird.f32 %v1817_v61 }
 0x215   :  { %v1248_v50 = vsel %vm1245_vm2, %v1247_v43, %v1243_v4  ;;  %1820 = vrcp.f32 %v1107_v48  ;;  %vm1257_vm5 = vmor %vm1255_vm4, %vm1256_vm3  ;;  %v1276_v58 = vand.u32 2147483648, %v1107_v48  ;;  %v1274_v20 = vand.u32 2147483647, %v1107_v48 }
 0x216   :  { %1617 = vst.msk [vmem:[%s3092_s5 + $0x38] sm:$0xff] %vm204_vm0, %v1248_v50  ;;  %v1252_v9 = vsub.f32 1.0, %v1251_v42  ;;  %v782_v7 = vmax.f32 %v745_v52, 0.0  ;;  %vm1270_vm8 = vweird.f32 %v1107_v48  ;;  %v784_v50 = vmax.f32 %v2863_v62, 0.0 }
 0x217   :  { %v939_v38 = vpop.f32.mrf.mxu3  ;;  %v1277_v40 = vor.u32 1.1754944e-38, %v1276_v58  ;;  %vm1275_vm10 = vcmp.eq.f32.partialorder %v1274_v20, 8.507059e+37 }
 0x218   :  { %v1253_v37 = vmul.f32 %v1817_v61, %v1252_v9  ;;  %v940_v59 = vadd.f32 %v2819_v14, %v939_v38 }
 0x21a   :  { %v1819_v29 = vpop.eup %1818  ;;  %v1254_v56 = vadd.f32 %v1817_v61, %v1253_v37  ;;  %v1721_v41 = vmul.f32 -1.442695, %v940_v59 }
 0x21b   :  { %v1821_v36 = vpop.eup %1820  ;;  %v1108_v51 = vadd.f32 1.0, %v1819_v29  ;;  %1706 = vmatmul.msk.f32.gmra.mxu3 %vm204_vm0, %v781_v8 }
 0x21c   :  { %v1258_v32 = vsel %vm1257_vm5, %v1817_v61, %v1254_v56  ;;  %v1266_v55 = vmul.f32 %v1821_v36, %v1107_v48  ;;  %1822 = vpow2.f32 %v1721_v41  ;;  %vm1271_vm7 = vweird.f32 %v1821_v36 }
 0x21d   :  { %v1263_v60 = vsel %vm1260_vm6, %v1262_v45, %v1258_v32  ;;  %1824 = vrcp.f32 %v1108_v51  ;;  %vm1272_vm9 = vmor %vm1270_vm8, %vm1271_vm7  ;;  %v1291_v25 = vand.u32 2147483648, %v1108_v51  ;;  %v1289_v34 = vand.u32 2147483647, %v1108_v51 }
 0x21e   :  { %1618 = vst.msk [vmem:[%s3092_s5 + $0x40] sm:$0xff] %vm204_vm0, %v1263_v60  ;;  %v1267_v46 = vsub.f32 1.0, %v1266_v55  ;;  %vm1285_vm12 = vweird.f32 %v1108_v51 }
 0x21f   :  { %v942_v24 = vpop.f32.mrf.mxu3  ;;  %v1292_v35 = vor.u32 1.1754944e-38, %v1291_v25  ;;  %vm1290_vm14 = vcmp.eq.f32.partialorder %v1289_v34, 8.507059e+37 }
 0x220   :  { %v1268_v63 = vmul.f32 %v1821_v36, %v1267_v46  ;;  %v943_v11 = vadd.f32 %v2819_v14, %v942_v24 }
 0x222   :  { %v1823_v30 = vpop.eup %1822  ;;  %v1269_v44 = vadd.f32 %v1821_v36, %v1268_v63  ;;  %v1722_v10 = vmul.f32 -1.442695, %v943_v11 }
 0x223   :  { %v1825_v28 = vpop.eup %1824  ;;  %v1109_v5 = vadd.f32 1.0, %v1823_v30  ;;  %1707 = vmatmul.msk.f32.gmra.mxu3 %vm204_vm0, %v782_v7 }
 0x224   :  { %v1273_v47 = vsel %vm1272_vm9, %v1821_v36, %v1269_v44  ;;  %v1281_v53 = vmul.f32 %v1825_v28, %v1108_v51  ;;  %1826 = vpow2.f32 %v1722_v10  ;;  %vm1286_vm11 = vweird.f32 %v1825_v28 }
 0x225   :  { %v1278_v3 = vsel %vm1275_vm10, %v1277_v40, %v1273_v47  ;;  %1828 = vrcp.f32 %v1109_v5  ;;  %vm1287_vm13 = vmor %vm1285_vm12, %vm1286_vm11  ;;  %v1306_v48 = vand.u32 2147483648, %v1109_v5  ;;  %v1304_v19 = vand.u32 2147483647, %v1109_v5 }
 0x226   :  { %1619 = vst.msk [vmem:[%s3092_s5 + $0x48] sm:$0xff] %vm204_vm0, %v1278_v3  ;;  %v1282_v23 = vsub.f32 1.0, %v1281_v53  ;;  %vm1300_vm1 = vweird.f32 %v1109_v5 }
 0x227   :  { %v945_v22 = vpop.f32.mrf.mxu3  ;;  %v1307_v0 = vor.u32 1.1754944e-38, %v1306_v48  ;;  %vm1305_vm3 = vcmp.eq.f32.partialorder %v1304_v19, 8.507059e+37 }
 0x228   :  { %v1283_v31 = vmul.f32 %v1825_v28, %v1282_v23  ;;  %v946_v26 = vadd.f32 %v2819_v14, %v945_v22 }
 0x22a   :  { %v1827_v39 = vpop.eup %1826  ;;  %v1284_v21 = vadd.f32 %v1825_v28, %v1283_v31  ;;  %v1723_v57 = vmul.f32 -1.442695, %v946_v26 }
 0x22b   :  { %v1829_v49 = vpop.eup %1828  ;;  %v1110_v33 = vadd.f32 1.0, %v1827_v39  ;;  %1708 = vmatmul.msk.f32.gmra.mxu3 %vm204_vm0, %v783_v54 }
 0x22c   :  { %v1288_v61 = vsel %vm1287_vm13, %v1825_v28, %v1284_v21  ;;  %v1296_v18 = vmul.f32 %v1829_v49, %v1109_v5  ;;  %1830 = vpow2.f32 %v1723_v57  ;;  %vm1301_vm15 = vweird.f32 %v1829_v49 }
 0x22d   :  { %v1293_v16 = vsel %vm1290_vm14, %v1292_v35, %v1288_v61  ;;  %1832 = vrcp.f32 %v1110_v33  ;;  %vm1302_vm2 = vmor %vm1300_vm1, %vm1301_vm15  ;;  %v1321_v56 = vand.u32 2147483648, %v1110_v33  ;;  %v1319_v2 = vand.u32 2147483647, %v1110_v33 }
 0x22e   :  { %1620 = vst.msk [vmem:[%s3092_s5 + $0x50] sm:$0xff] %vm204_vm0, %v1293_v16  ;;  %v1297_v43 = vsub.f32 1.0, %v1296_v18  ;;  %vm1315_vm5 = vweird.f32 %v1110_v33 }
 0x22f   :  { %v948_v4 = vpop.f32.mrf.mxu3  ;;  %v1322_v52 = vor.u32 1.1754944e-38, %v1321_v56  ;;  %vm1320_vm7 = vcmp.eq.f32.partialorder %v1319_v2, 8.507059e+37 }
 0x230   :  { %v1298_v42 = vmul.f32 %v1829_v49, %v1297_v43  ;;  %v949_v12 = vadd.f32 %v2819_v14, %v948_v4 }
 0x232   :  { %v1831_v9 = vpop.eup %1830  ;;  %v1299_v1 = vadd.f32 %v1829_v49, %v1298_v42  ;;  %v1724_v38 = vmul.f32 -1.442695, %v949_v12 }
 0x233   :  { %v1833_v37 = vpop.eup %1832  ;;  %v1111_v59 = vadd.f32 1.0, %v1831_v9  ;;  %1709 = vmatmul.msk.f32.gmra.mxu3 %vm204_vm0, %v784_v50 }
 0x234   :  { %v1303_v8 = vsel %vm1302_vm2, %v1829_v49, %v1299_v1  ;;  %v1311_v27 = vmul.f32 %v1833_v37, %v1110_v33  ;;  %1834 = vpow2.f32 %v1724_v38  ;;  %vm1316_vm4 = vweird.f32 %v1833_v37 }
 0x235   :  { %v1308_v29 = vsel %vm1305_vm3, %v1307_v0, %v1303_v8  ;;  %1836 = vrcp.f32 %v1111_v59  ;;  %vm1317_vm6 = vmor %vm1315_vm5, %vm1316_vm4  ;;  %v1336_v63 = vand.u32 2147483648, %v1111_v59  ;;  %v1334_v7 = vand.u32 2147483647, %v1111_v59 }
 0x236   :  { %1621 = vst.msk [vmem:[%s3092_s5 + $0x58] sm:$0xff] %vm204_vm0, %v1308_v29  ;;  %v1312_v62 = vsub.f32 1.0, %v1311_v27  ;;  %vm1330_vm9 = vweird.f32 %v1111_v59 }
 0x237   :  { %v951_v41 = vpop.f32.mrf.mxu3  ;;  %v1337_v40 = vor.u32 1.1754944e-38, %v1336_v63  ;;  %vm1335_vm11 = vcmp.eq.f32.partialorder %v1334_v7, 8.507059e+37 }
 0x238   :  { %v1313_v36 = vmul.f32 %v1833_v37, %v1312_v62  ;;  %v952_v17 = vadd.f32 %v2819_v14, %v951_v41 }
 0x23a   :  { %v1835_v45 = vpop.eup %1834  ;;  %v1314_v51 = vadd.f32 %v1833_v37, %v1313_v36  ;;  %v1725_v32 = vmul.f32 -1.442695, %v952_v17 }
 0x23b   :  { %v1837_v55 = vpop.eup %1836  ;;  %v1112_v15 = vadd.f32 1.0, %v1835_v45 }
 0x23c   :  { %v1318_v60 = vsel %vm1317_vm6, %v1833_v37, %v1314_v51  ;;  %v1326_v46 = vmul.f32 %v1837_v55, %v1111_v59  ;;  %1838 = vpow2.f32 %v1725_v32  ;;  %vm1331_vm8 = vweird.f32 %v1837_v55 }
 0x23d   :  { %v1323_v58 = vsel %vm1320_vm7, %v1322_v52, %v1318_v60  ;;  %1840 = vrcp.f32 %v1112_v15  ;;  %vm1332_vm10 = vmor %vm1330_vm9, %vm1331_vm8  ;;  %v1351_v23 = vand.u32 2147483648, %v1112_v15  ;;  %v1349_v31 = vand.u32 2147483647, %v1112_v15 }
 0x23e   :  { %1622 = vst.msk [vmem:[%s3092_s5 + $0x60] sm:$0xff] %vm204_vm0, %v1323_v58  ;;  %v1327_v24 = vsub.f32 1.0, %v1326_v46  ;;  %vm1345_vm13 = vweird.f32 %v1112_v15 }
 0x23f   :  { %v954_v20 = vpop.f32.mrf.mxu3  ;;  %v1352_v57 = vor.u32 1.1754944e-38, %v1351_v23  ;;  %vm1350_vm15 = vcmp.eq.f32.partialorder %v1349_v31, 8.507059e+37  ;;  %v3018_v23 = vld [vmem:[%s3091_s4] ss:$0 sm:$0xff] }
 0x240   :  { %v1328_v11 = vmul.f32 %v1837_v55, %v1327_v24  ;;  %v955_v13 = vadd.f32 %v2819_v14, %v954_v20 }
 0x242   :  { %v1839_v30 = vpop.eup %1838  ;;  %v1329_v44 = vadd.f32 %v1837_v55, %v1328_v11  ;;  %v1726_v10 = vmul.f32 -1.442695, %v955_v13 }
 0x243   :  { %v1841_v28 = vpop.eup %1840  ;;  %v1113_v5 = vadd.f32 1.0, %v1839_v30 }
 0x244   :  { %v1333_v47 = vsel %vm1332_vm10, %v1837_v55, %v1329_v44  ;;  %v1341_v53 = vmul.f32 %v1841_v28, %v1112_v15  ;;  %1842 = vpow2.f32 %v1726_v10  ;;  %vm1346_vm12 = vweird.f32 %v1841_v28 }
 0x245   :  { %v1338_v6 = vsel %vm1335_vm11, %v1337_v40, %v1333_v47  ;;  %1844 = vrcp.f32 %v1113_v5  ;;  %vm1347_vm14 = vmor %vm1345_vm13, %vm1346_vm12  ;;  %v1366_v16 = vand.u32 2147483648, %v1113_v5  ;;  %v1364_v4 = vand.u32 2147483647, %v1113_v5 }
 0x246   :  { %1623 = vst.msk [vmem:[%s3092_s5 + $0x68] sm:$0xff] %vm204_vm0, %v1338_v6  ;;  %v1342_v3 = vsub.f32 1.0, %v1341_v53  ;;  %vm1360_vm2 = vweird.f32 %v1113_v5 }
 0x247   :  { %v957_v25 = vpop.f32.mrf.mxu3  ;;  %v1367_v1 = vor.u32 1.1754944e-38, %v1366_v16  ;;  %vm1365_vm4 = vcmp.eq.f32.partialorder %v1364_v4, 8.507059e+37 }
 0x248   :  { %v1343_v22 = vmul.f32 %v1841_v28, %v1342_v3  ;;  %v958_v34 = vadd.f32 %v2819_v14, %v957_v25 }
 0x24a   :  { %v1843_v26 = vpop.eup %1842  ;;  %v1344_v54 = vadd.f32 %v1841_v28, %v1343_v22  ;;  %v1727_v39 = vmul.f32 -1.442695, %v958_v34 }
 0x24b   :  { %v1845_v21 = vpop.eup %1844  ;;  %v1114_v49 = vadd.f32 1.0, %v1843_v26 }
 0x24c   :  { %v1348_v35 = vsel %vm1347_vm14, %v1841_v28, %v1344_v54  ;;  %v1356_v33 = vmul.f32 %v1845_v21, %v1113_v5  ;;  %1846 = vpow2.f32 %v1727_v39  ;;  %vm1361_vm1 = vweird.f32 %v1845_v21 }
 0x24d   :  { %v1353_v61 = vsel %vm1350_vm15, %v1352_v57, %v1348_v35  ;;  %1848 = vrcp.f32 %v1114_v49  ;;  %vm1362_vm3 = vmor %vm1360_vm2, %vm1361_vm1  ;;  %v1381_v27 = vand.u32 2147483648, %v1114_v49  ;;  %v1379_v56 = vand.u32 2147483647, %v1114_v49 }
 0x24e   :  { %1624 = vst.msk [vmem:[%s3092_s5 + $0x70] sm:$0xff] %vm204_vm0, %v1353_v61  ;;  %v1357_v18 = vsub.f32 1.0, %v1356_v33  ;;  %vm1375_vm6 = vweird.f32 %v1114_v49 }
 0x24f   :  { %v960_v43 = vpop.f32.mrf.mxu3  ;;  %v1382_v51 = vor.u32 1.1754944e-38, %v1381_v27  ;;  %vm1380_vm8 = vcmp.eq.f32.partialorder %v1379_v56, 8.507059e+37 }
 0x250   :  { %v1358_v48 = vmul.f32 %v1845_v21, %v1357_v18  ;;  %v961_v42 = vadd.f32 %v2819_v14, %v960_v43 }
 0x252   :  { %v1847_v19 = vpop.eup %1846  ;;  %v1359_v12 = vadd.f32 %v1845_v21, %v1358_v48  ;;  %v1728_v50 = vmul.f32 -1.442695, %v961_v42 }
 0x253   :  { %v1849_v9 = vpop.eup %1848  ;;  %v1115_v38 = vadd.f32 1.0, %v1847_v19 }
 0x254   :  { %v1363_v37 = vsel %vm1362_vm3, %v1845_v21, %v1359_v12  ;;  %v1371_v0 = vmul.f32 %v1849_v9, %v1114_v49  ;;  %1850 = vpow2.f32 %v1728_v50  ;;  %vm1376_vm5 = vweird.f32 %v1849_v9 }
 0x255   :  { %v1368_v59 = vsel %vm1365_vm4, %v1367_v1, %v1363_v37  ;;  %1852 = vrcp.f32 %v1115_v38  ;;  %vm1377_vm7 = vmor %vm1375_vm6, %vm1376_vm5  ;;  %v1396_v46 = vand.u32 2147483648, %v1115_v38  ;;  %v1394_v63 = vand.u32 2147483647, %v1115_v38 }
 0x256   :  { %1625 = vst.msk [vmem:[%s3092_s5 + $0x78] sm:$0xff] %vm204_vm0, %v1368_v59  ;;  %v1372_v8 = vsub.f32 1.0, %v1371_v0  ;;  %vm1390_vm10 = vweird.f32 %v1115_v38 }
 0x257   :  { %v963_v29 = vpop.f32.mrf.mxu3  ;;  %v1397_v44 = vor.u32 1.1754944e-38, %v1396_v46  ;;  %vm1395_vm12 = vcmp.eq.f32.partialorder %v1394_v63, 8.507059e+37 }
 0x258   :  { %v1373_v62 = vmul.f32 %v1849_v9, %v1372_v8  ;;  %v964_v41 = vadd.f32 %v2819_v14, %v963_v29 }
 0x25a   :  { %v1851_v36 = vpop.eup %1850  ;;  %v1374_v2 = vadd.f32 %v1849_v9, %v1373_v62  ;;  %v1729_v17 = vmul.f32 -1.442695, %v964_v41 }
 0x25b   :  { %v1853_v45 = vpop.eup %1852  ;;  %v1116_v32 = vadd.f32 1.0, %v1851_v36 }
 0x25c   :  { %v1378_v55 = vsel %vm1377_vm7, %v1849_v9, %v1374_v2  ;;  %v1386_v52 = vmul.f32 %v1853_v45, %v1115_v38  ;;  %1854 = vpow2.f32 %v1729_v17  ;;  %vm1391_vm9 = vweird.f32 %v1853_v45 }
 0x25d   :  { %v1383_v15 = vsel %vm1380_vm8, %v1382_v51, %v1378_v55  ;;  %1856 = vrcp.f32 %v1116_v32  ;;  %vm1392_vm11 = vmor %vm1390_vm10, %vm1391_vm9  ;;  %v1411_v47 = vand.u32 2147483648, %v1116_v32  ;;  %v1409_v3 = vand.u32 2147483647, %v1116_v32 }
 0x25e   :  { %1626 = vst.msk [vmem:[%s3092_s5 + $0x80] sm:$0xff] %vm204_vm0, %v1383_v15  ;;  %v1387_v60 = vsub.f32 1.0, %v1386_v52  ;;  %vm1405_vm14 = vweird.f32 %v1116_v32 }
 0x25f   :  { %v966_v58 = vpop.f32.mrf.mxu3  ;;  %v1412_v54 = vor.u32 1.1754944e-38, %v1411_v47  ;;  %vm1410_vm1 = vcmp.eq.f32.partialorder %v1409_v3, 8.507059e+37 }
 0x260   :  { %v1388_v24 = vmul.f32 %v1853_v45, %v1387_v60  ;;  %v967_v20 = vadd.f32 %v2819_v14, %v966_v58 }
 0x262   :  { %v1855_v11 = vpop.eup %1854  ;;  %v1389_v7 = vadd.f32 %v1853_v45, %v1388_v24  ;;  %v1730_v13 = vmul.f32 -1.442695, %v967_v20 }
 0x263   :  { %v1857_v30 = vpop.eup %1856  ;;  %v1117_v10 = vadd.f32 1.0, %v1855_v11 }
 0x264   :  { %v1393_v28 = vsel %vm1392_vm11, %v1853_v45, %v1389_v7  ;;  %v1401_v40 = vmul.f32 %v1857_v30, %v1116_v32  ;;  %1858 = vpow2.f32 %v1730_v13  ;;  %vm1406_vm13 = vweird.f32 %v1857_v30 }
 0x265   :  { %v1398_v5 = vsel %vm1395_vm12, %v1397_v44, %v1393_v28  ;;  %1860 = vrcp.f32 %v1117_v10  ;;  %vm1407_vm15 = vmor %vm1405_vm14, %vm1406_vm13  ;;  %v1426_v33 = vand.u32 2147483648, %v1117_v10  ;;  %v1424_v16 = vand.u32 2147483647, %v1117_v10 }
 0x266   :  { %1627 = vst.msk [vmem:[%s3092_s5 + $0x88] sm:$0xff] %vm204_vm0, %v1398_v5  ;;  %v1402_v14 = vsub.f32 1.0, %v1401_v40  ;;  %vm1420_vm3 = vweird.f32 %v1117_v10 }
 0x267   :  { %v969_v53 = vpop.f32.mrf.mxu3  ;;  %v1427_v12 = vor.u32 1.1754944e-38, %v1426_v33  ;;  %vm1425_vm5 = vcmp.eq.f32.partialorder %v1424_v16, 8.507059e+37 }
 0x268   :  { %v1403_v6 = vmul.f32 %v1857_v30, %v1402_v14  ;;  %v970_v25 = vadd.f32 %v3018_v23, %v969_v53 }
 0x26a   :  { %v1859_v22 = vpop.eup %1858  ;;  %v1404_v31 = vadd.f32 %v1857_v30, %v1403_v6  ;;  %v1731_v34 = vmul.f32 -1.442695, %v970_v25 }
 0x26b   :  { %v1861_v26 = vpop.eup %1860  ;;  %v1118_v39 = vadd.f32 1.0, %v1859_v22 }
 0x26c   :  { %v1408_v21 = vsel %vm1407_vm15, %v1857_v30, %v1404_v31  ;;  %v1416_v57 = vmul.f32 %v1861_v26, %v1117_v10  ;;  %1862 = vpow2.f32 %v1731_v34  ;;  %vm1421_vm2 = vweird.f32 %v1861_v26 }
 0x26d   :  { %v1413_v49 = vsel %vm1410_vm1, %v1412_v54, %v1408_v21  ;;  %1864 = vrcp.f32 %v1118_v39  ;;  %vm1422_vm4 = vmor %vm1420_vm3, %vm1421_vm2  ;;  %v1441_v0 = vand.u32 2147483648, %v1118_v39  ;;  %v1439_v27 = vand.u32 2147483647, %v1118_v39 }
 0x26e   :  { %1628 = vst.msk [vmem:[%s3092_s5 + $0x90] sm:$0xff] %vm204_vm0, %v1413_v49  ;;  %v1417_v35 = vsub.f32 1.0, %v1416_v57  ;;  %vm1435_vm7 = vweird.f32 %v1118_v39 }
 0x26f   :  { %v972_v61 = vpop.f32.mrf.mxu3  ;;  %v1442_v2 = vor.u32 1.1754944e-38, %v1441_v0  ;;  %vm1440_vm9 = vcmp.eq.f32.partialorder %v1439_v27, 8.507059e+37 }
 0x270   :  { %v1418_v18 = vmul.f32 %v1861_v26, %v1417_v35  ;;  %v973_v43 = vadd.f32 %v3018_v23, %v972_v61 }
 0x272   :  { %v1863_v48 = vpop.eup %1862  ;;  %v1419_v4 = vadd.f32 %v1861_v26, %v1418_v18  ;;  %v1732_v42 = vmul.f32 -1.442695, %v973_v43 }
 0x273   :  { %v1865_v19 = vpop.eup %1864  ;;  %v1119_v50 = vadd.f32 1.0, %v1863_v48 }
 0x274   :  { %v1423_v9 = vsel %vm1422_vm4, %v1861_v26, %v1419_v4  ;;  %v1431_v1 = vmul.f32 %v1865_v19, %v1118_v39  ;;  %1866 = vpow2.f32 %v1732_v42  ;;  %vm1436_vm6 = vweird.f32 %v1865_v19 }
 0x275   :  { %v1428_v38 = vsel %vm1425_vm5, %v1427_v12, %v1423_v9  ;;  %1868 = vrcp.f32 %v1119_v50  ;;  %vm1437_vm8 = vmor %vm1435_vm7, %vm1436_vm6  ;;  %v1456_v52 = vand.u32 2147483648, %v1119_v50  ;;  %v1454_v46 = vand.u32 2147483647, %v1119_v50 }
 0x276   :  { %1629 = vst.msk [vmem:[%s3092_s5 + $0x98] sm:$0xff] %vm204_vm0, %v1428_v38  ;;  %v1432_v37 = vsub.f32 1.0, %v1431_v1  ;;  %vm1450_vm11 = vweird.f32 %v1119_v50 }
 0x277   :  { %v975_v59 = vpop.f32.mrf.mxu3  ;;  %v1457_v7 = vor.u32 1.1754944e-38, %v1456_v52  ;;  %vm1455_vm13 = vcmp.eq.f32.partialorder %v1454_v46, 8.507059e+37 }
 0x278   :  { %v1433_v8 = vmul.f32 %v1865_v19, %v1432_v37  ;;  %v976_v29 = vadd.f32 %v3018_v23, %v975_v59 }
 0x27a   :  { %v1867_v62 = vpop.eup %1866  ;;  %v1434_v56 = vadd.f32 %v1865_v19, %v1433_v8  ;;  %v1733_v41 = vmul.f32 -1.442695, %v976_v29 }
 0x27b   :  { %v1869_v36 = vpop.eup %1868  ;;  %v1120_v17 = vadd.f32 1.0, %v1867_v62 }
 0x27c   :  { %v1438_v45 = vsel %vm1437_vm8, %v1865_v19, %v1434_v56  ;;  %v1446_v51 = vmul.f32 %v1869_v36, %v1119_v50  ;;  %1870 = vpow2.f32 %v1733_v41  ;;  %vm1451_vm10 = vweird.f32 %v1869_v36 }
 0x27d   :  { %v1443_v32 = vsel %vm1440_vm9, %v1442_v2, %v1438_v45  ;;  %1872 = vrcp.f32 %v1120_v17  ;;  %vm1452_vm12 = vmor %vm1450_vm11, %vm1451_vm10  ;;  %v1471_v40 = vand.u32 2147483648, %v1120_v17  ;;  %v1469_v47 = vand.u32 2147483647, %v1120_v17 }
 0x27e   :  { %1630 = vst.msk [vmem:[%s3092_s5 + $0xa0] sm:$0xff] %vm204_vm0, %v1443_v32  ;;  %v1447_v55 = vsub.f32 1.0, %v1446_v51  ;;  %vm1465_vm15 = vweird.f32 %v1120_v17 }
 0x27f   :  { %v978_v15 = vpop.f32.mrf.mxu3  ;;  %v1472_v31 = vor.u32 1.1754944e-38, %v1471_v40  ;;  %vm1470_vm2 = vcmp.eq.f32.partialorder %v1469_v47, 8.507059e+37 }
 0x280   :  { %v1448_v60 = vmul.f32 %v1869_v36, %v1447_v55  ;;  %v979_v58 = vadd.f32 %v3018_v23, %v978_v15 }
 0x282   :  { %v1871_v24 = vpop.eup %1870  ;;  %v1449_v63 = vadd.f32 %v1869_v36, %v1448_v60  ;;  %v1734_v20 = vmul.f32 -1.442695, %v979_v58 }
 0x283   :  { %v1873_v11 = vpop.eup %1872  ;;  %v1121_v13 = vadd.f32 1.0, %v1871_v24 }
 0x284   :  { %v1453_v30 = vsel %vm1452_vm12, %v1869_v36, %v1449_v63  ;;  %v1461_v44 = vmul.f32 %v1873_v11, %v1120_v17  ;;  %1874 = vpow2.f32 %v1734_v20  ;;  %vm1466_vm14 = vweird.f32 %v1873_v11 }
 0x285   :  { %v1458_v10 = vsel %vm1455_vm13, %v1457_v7, %v1453_v30  ;;  %1876 = vrcp.f32 %v1121_v13  ;;  %vm1467_vm1 = vmor %vm1465_vm15, %vm1466_vm14  ;;  %v1486_v57 = vand.u32 2147483648, %v1121_v13  ;;  %v1484_v33 = vand.u32 2147483647, %v1121_v13 }
 0x286   :  { %1631 = vst.msk [vmem:[%s3092_s5 + $0xa8] sm:$0xff] %vm204_vm0, %v1458_v10  ;;  %v1462_v28 = vsub.f32 1.0, %v1461_v44  ;;  %vm1480_vm4 = vweird.f32 %v1121_v13 }
 0x287   :  { %v981_v5 = vpop.f32.mrf.mxu3  ;;  %v1487_v4 = vor.u32 1.1754944e-38, %v1486_v57  ;;  %vm1485_vm6 = vcmp.eq.f32.partialorder %v1484_v33, 8.507059e+37 }
 0x288   :  { %v1463_v14 = vmul.f32 %v1873_v11, %v1462_v28  ;;  %v982_v53 = vadd.f32 %v3018_v23, %v981_v5 }
 0x28a   :  { %v1875_v6 = vpop.eup %1874  ;;  %v1464_v3 = vadd.f32 %v1873_v11, %v1463_v14  ;;  %v1735_v25 = vmul.f32 -1.442695, %v982_v53 }
 0x28b   :  { %v1877_v22 = vpop.eup %1876  ;;  %v1122_v34 = vadd.f32 1.0, %v1875_v6 }
 0x28c   :  { %v1468_v26 = vsel %vm1467_vm1, %v1873_v11, %v1464_v3  ;;  %v1476_v54 = vmul.f32 %v1877_v22, %v1121_v13  ;;  %1878 = vpow2.f32 %v1735_v25  ;;  %vm1481_vm3 = vweird.f32 %v1877_v22 }
 0x28d   :  { %v1473_v39 = vsel %vm1470_vm2, %v1472_v31, %v1468_v26  ;;  %1880 = vrcp.f32 %v1122_v34  ;;  %vm1482_vm5 = vmor %vm1480_vm4, %vm1481_vm3  ;;  %v1501_v1 = vand.u32 2147483648, %v1122_v34  ;;  %v1499_v0 = vand.u32 2147483647, %v1122_v34 }
 0x28e   :  { %1632 = vst.msk [vmem:[%s3092_s5 + $0xb0] sm:$0xff] %vm204_vm0, %v1473_v39  ;;  %v1477_v21 = vsub.f32 1.0, %v1476_v54  ;;  %vm1495_vm8 = vweird.f32 %v1122_v34 }
 0x28f   :  { %v984_v49 = vpop.f32.mrf.mxu3  ;;  %v1502_v56 = vor.u32 1.1754944e-38, %v1501_v1  ;;  %vm1500_vm10 = vcmp.eq.f32.partialorder %v1499_v0, 8.507059e+37 }
 0x290   :  { %v1478_v35 = vmul.f32 %v1877_v22, %v1477_v21  ;;  %v985_v61 = vadd.f32 %v3018_v23, %v984_v49 }
 0x292   :  { %v1879_v18 = vpop.eup %1878  ;;  %v1479_v16 = vadd.f32 %v1877_v22, %v1478_v35  ;;  %v1736_v43 = vmul.f32 -1.442695, %v985_v61 }
 0x293   :  { %v1881_v48 = vpop.eup %1880  ;;  %v1123_v42 = vadd.f32 1.0, %v1879_v18 }
 0x294   :  { %v1483_v19 = vsel %vm1482_vm5, %v1877_v22, %v1479_v16  ;;  %v1491_v12 = vmul.f32 %v1881_v48, %v1122_v34  ;;  %1882 = vpow2.f32 %v1736_v43  ;;  %vm1496_vm7 = vweird.f32 %v1881_v48 }
 0x295   :  { %v1488_v50 = vsel %vm1485_vm6, %v1487_v4, %v1483_v19  ;;  %1884 = vrcp.f32 %v1123_v42  ;;  %vm1497_vm9 = vmor %vm1495_vm8, %vm1496_vm7  ;;  %v1516_v51 = vand.u32 2147483648, %v1123_v42  ;;  %v1514_v52 = vand.u32 2147483647, %v1123_v42 }
 0x296   :  { %1633 = vst.msk [vmem:[%s3092_s5 + $0xb8] sm:$0xff] %vm204_vm0, %v1488_v50  ;;  %v1492_v9 = vsub.f32 1.0, %v1491_v12  ;;  %vm1510_vm12 = vweird.f32 %v1123_v42 }
 0x297   :  { %v987_v38 = vpop.f32.mrf.mxu3  ;;  %v1517_v63 = vor.u32 1.1754944e-38, %v1516_v51  ;;  %vm1515_vm14 = vcmp.eq.f32.partialorder %v1514_v52, 8.507059e+37 }
 0x298   :  { %v1493_v37 = vmul.f32 %v1881_v48, %v1492_v9  ;;  %v988_v59 = vadd.f32 %v3018_v23, %v987_v38 }
 0x29a   :  { %v1883_v8 = vpop.eup %1882  ;;  %v1494_v27 = vadd.f32 %v1881_v48, %v1493_v37  ;;  %v1737_v29 = vmul.f32 -1.442695, %v988_v59 }
 0x29b   :  { %v1885_v62 = vpop.eup %1884  ;;  %v1124_v41 = vadd.f32 1.0, %v1883_v8 }
 0x29c   :  { %v1498_v36 = vsel %vm1497_vm9, %v1881_v48, %v1494_v27  ;;  %v1506_v2 = vmul.f32 %v1885_v62, %v1123_v42  ;;  %1886 = vpow2.f32 %v1737_v29  ;;  %vm1511_vm11 = vweird.f32 %v1885_v62 }
 0x29d   :  { %v1503_v17 = vsel %vm1500_vm10, %v1502_v56, %v1498_v36  ;;  %1888 = vrcp.f32 %v1124_v41  ;;  %vm1512_vm13 = vmor %vm1510_vm12, %vm1511_vm11  ;;  %v1531_v44 = vand.u32 2147483648, %v1124_v41  ;;  %v1529_v40 = vand.u32 2147483647, %v1124_v41 }
 0x29e   :  { %1634 = vst.msk [vmem:[%s3092_s5 + $0xc0] sm:$0xff] %vm204_vm0, %v1503_v17  ;;  %v1507_v45 = vsub.f32 1.0, %v1506_v2  ;;  %vm1525_vm1 = vweird.f32 %v1124_v41 }
 0x29f   :  { %v990_v32 = vpop.f32.mrf.mxu3  ;;  %v1532_v3 = vor.u32 1.1754944e-38, %v1531_v44  ;;  %vm1530_vm3 = vcmp.eq.f32.partialorder %v1529_v40, 8.507059e+37 }
 0x2a0   :  { %v1508_v55 = vmul.f32 %v1885_v62, %v1507_v45  ;;  %v991_v15 = vadd.f32 %v3018_v23, %v990_v32 }
 0x2a2   :  { %v1887_v60 = vpop.eup %1886  ;;  %v1509_v46 = vadd.f32 %v1885_v62, %v1508_v55  ;;  %v1738_v58 = vmul.f32 -1.442695, %v991_v15 }
 0x2a3   :  { %v1889_v24 = vpop.eup %1888  ;;  %v1125_v20 = vadd.f32 1.0, %v1887_v60 }
 0x2a4   :  { %v1513_v11 = vsel %vm1512_vm13, %v1885_v62, %v1509_v46  ;;  %v1521_v7 = vmul.f32 %v1889_v24, %v1124_v41  ;;  %1890 = vpow2.f32 %v1738_v58  ;;  %vm1526_vm15 = vweird.f32 %v1889_v24 }
 0x2a5   :  { %v1518_v13 = vsel %vm1515_vm14, %v1517_v63, %v1513_v11  ;;  %1892 = vrcp.f32 %v1125_v20  ;;  %vm1527_vm2 = vmor %vm1525_vm1, %vm1526_vm15  ;;  %v1546_v54 = vand.u32 2147483648, %v1125_v20  ;;  %v1544_v57 = vand.u32 2147483647, %v1125_v20 }
 0x2a6   :  { %1635 = vst.msk [vmem:[%s3092_s5 + $0xc8] sm:$0xff] %vm204_vm0, %v1518_v13  ;;  %v1522_v30 = vsub.f32 1.0, %v1521_v7  ;;  %vm1540_vm5 = vweird.f32 %v1125_v20 }
 0x2a7   :  { %v993_v10 = vpop.f32.mrf.mxu3  ;;  %v1547_v16 = vor.u32 1.1754944e-38, %v1546_v54  ;;  %vm1545_vm7 = vcmp.eq.f32.partialorder %v1544_v57, 8.507059e+37 }
 0x2a8   :  { %v1523_v28 = vmul.f32 %v1889_v24, %v1522_v30  ;;  %v994_v5 = vadd.f32 %v3018_v23, %v993_v10 }
 0x2aa   :  { %v1891_v14 = vpop.eup %1890  ;;  %v1524_v47 = vadd.f32 %v1889_v24, %v1523_v28  ;;  %v1739_v53 = vmul.f32 -1.442695, %v994_v5 }
 0x2ab   :  { %v1893_v6 = vpop.eup %1892  ;;  %v1126_v25 = vadd.f32 1.0, %v1891_v14 }
 0x2ac   :  { %v1528_v22 = vsel %vm1527_vm2, %v1889_v24, %v1524_v47  ;;  %v1536_v31 = vmul.f32 %v1893_v6, %v1125_v20  ;;  %1894 = vpow2.f32 %v1739_v53  ;;  %vm1541_vm4 = vweird.f32 %v1893_v6 }
 0x2ad   :  { %v1533_v34 = vsel %vm1530_vm3, %v1532_v3, %v1528_v22  ;;  %1896 = vrcp.f32 %v1126_v25  ;;  %vm1542_vm6 = vmor %vm1540_vm5, %vm1541_vm4  ;;  %v1561_v12 = vand.u32 2147483648, %v1126_v25  ;;  %v1559_v1 = vand.u32 2147483647, %v1126_v25 }
 0x2ae   :  { %1636 = vst.msk [vmem:[%s3092_s5 + $0xd0] sm:$0xff] %vm204_vm0, %v1533_v34  ;;  %v1537_v26 = vsub.f32 1.0, %v1536_v31  ;;  %vm1555_vm9 = vweird.f32 %v1126_v25 }
 0x2af   :  { %v996_v39 = vpop.f32.mrf.mxu3  ;;  %v1562_v27 = vor.u32 1.1754944e-38, %v1561_v12  ;;  %vm1560_vm11 = vcmp.eq.f32.partialorder %v1559_v1, 8.507059e+37 }
 0x2b0   :  { %v1538_v21 = vmul.f32 %v1893_v6, %v1537_v26  ;;  %v997_v49 = vadd.f32 %v3018_v23, %v996_v39 }
 0x2b2   :  { %v1895_v35 = vpop.eup %1894  ;;  %v1539_v33 = vadd.f32 %v1893_v6, %v1538_v21  ;;  %v1740_v61 = vmul.f32 -1.442695, %v997_v49 }
 0x2b3   :  { %v1897_v18 = vpop.eup %1896  ;;  %v1127_v43 = vadd.f32 1.0, %v1895_v35 }
 0x2b4   :  { %v1543_v48 = vsel %vm1542_vm6, %v1893_v6, %v1539_v33  ;;  %v1551_v4 = vmul.f32 %v1897_v18, %v1126_v25  ;;  %1898 = vpow2.f32 %v1740_v61  ;;  %vm1556_vm8 = vweird.f32 %v1897_v18 }
 0x2b5   :  { %v1548_v42 = vsel %vm1545_vm7, %v1547_v16, %v1543_v48  ;;  %1900 = vrcp.f32 %v1127_v43  ;;  %vm1557_vm10 = vmor %vm1555_vm9, %vm1556_vm8  ;;  %v1576_v36 = vand.u32 2147483648, %v1127_v43  ;;  %v1574_v17 = vand.u32 2147483647, %v1127_v43 }
 0x2b6   :  { %1637 = vst.msk [vmem:[%s3092_s5 + $0xd8] sm:$0xff] %vm204_vm0, %v1548_v42  ;;  %v1552_v19 = vsub.f32 1.0, %v1551_v4  ;;  %vm1570_vm13 = vweird.f32 %v1127_v43 }
 0x2b7   :  { %v999_v50 = vpop.f32.mrf.mxu3  ;;  %v1577_v55 = vor.u32 1.1754944e-38, %v1576_v36  ;;  %vm1575_vm15 = vcmp.eq.f32.partialorder %v1574_v17, 8.507059e+37 }
 0x2b8   :  { %v1553_v9 = vmul.f32 %v1897_v18, %v1552_v19  ;;  %v1000_v38 = vadd.f32 %v3018_v23, %v999_v50 }
 0x2ba   :  { %v1899_v37 = vpop.eup %1898  ;;  %v1554_v0 = vadd.f32 %v1897_v18, %v1553_v9  ;;  %v1741_v59 = vmul.f32 -1.442695, %v1000_v38 }
 0x2bb   :  { %v1901_v8 = vpop.eup %1900  ;;  %v1128_v29 = vadd.f32 1.0, %v1899_v37 }
 0x2bc   :  { %v1558_v62 = vsel %vm1557_vm10, %v1897_v18, %v1554_v0  ;;  %v1566_v56 = vmul.f32 %v1901_v8, %v1127_v43  ;;  %1902 = vpow2.f32 %v1741_v59  ;;  %vm1571_vm12 = vweird.f32 %v1901_v8 }
 0x2bd   :  { %v1563_v41 = vsel %vm1560_vm11, %v1562_v27, %v1558_v62  ;;  %1904 = vrcp.f32 %v1128_v29  ;;  %vm1572_vm14 = vmor %vm1570_vm13, %vm1571_vm12  ;;  %v1591_v24 = vand.u32 2147483648, %v1128_v29  ;;  %v1589_v20 = vand.u32 2147483647, %v1128_v29 }
 0x2be   :  { %1638 = vst.msk [vmem:[%s3092_s5 + $0xe0] sm:$0xff] %vm204_vm0, %v1563_v41  ;;  %v1567_v23 = vsub.f32 1.0, %v1566_v56  ;;  %vm1585_vm2 = vweird.f32 %v1128_v29 }
 0x2bf   :  { %v1592_v13 = vor.u32 1.1754944e-38, %v1591_v24  ;;  %vm1590_vm4 = vcmp.eq.f32.partialorder %v1589_v20, 8.507059e+37 }
 0x2c0   :  { %v1568_v2 = vmul.f32 %v1901_v8, %v1567_v23 }
 0x2c2   :  { %v1903_v45 = vpop.eup %1902  ;;  %v1569_v51 = vadd.f32 %v1901_v8, %v1568_v2 }
 0x2c3   :  { %v1905_v32 = vpop.eup %1904  ;;  %v1129_v52 = vadd.f32 1.0, %v1903_v45 }
 0x2c4   :  { %v1573_v15 = vsel %vm1572_vm14, %v1901_v8, %v1569_v51  ;;  %v1581_v60 = vmul.f32 %v1905_v32, %v1128_v29  ;;  %vm1586_vm1 = vweird.f32 %v1905_v32 }
 0x2c5   :  { %v1578_v46 = vsel %vm1575_vm15, %v1577_v55, %v1573_v15  ;;  %1906 = vrcp.f32 %v1129_v52  ;;  %vm1587_vm3 = vmor %vm1585_vm2, %vm1586_vm1  ;;  %v1606_v40 = vand.u32 2147483648, %v1129_v52  ;;  %v1604_v14 = vand.u32 2147483647, %v1129_v52 }
 0x2c6   :  { %1639 = vst.msk [vmem:[%s3092_s5 + $0xe8] sm:$0xff] %vm204_vm0, %v1578_v46  ;;  %v1582_v58 = vsub.f32 1.0, %v1581_v60  ;;  %vm1600_vm6 = vweird.f32 %v1129_v52 }
 0x2c7   :  { %v1607_v53 = vor.u32 1.1754944e-38, %v1606_v40  ;;  %vm1605_vm8 = vcmp.eq.f32.partialorder %v1604_v14, 8.507059e+37 }
 0x2c8   :  { %v1583_v63 = vmul.f32 %v1905_v32, %v1582_v58 }
 0x2ca   :  { %v1584_v11 = vadd.f32 %v1905_v32, %v1583_v63 }
 0x2cb   :  { %v1907_v7 = vpop.eup %1906 }
 0x2cc   :  { %v1588_v30 = vsel %vm1587_vm3, %v1905_v32, %v1584_v11  ;;  %v1596_v44 = vmul.f32 %v1907_v7, %v1129_v52  ;;  %vm1601_vm5 = vweird.f32 %v1907_v7 }
 0x2cd   :  { %v1593_v10 = vsel %vm1590_vm4, %v1592_v13, %v1588_v30  ;;  %vm1602_vm7 = vmor %vm1600_vm6, %vm1601_vm5 }
 0x2ce   :  { %1640 = vst.msk [vmem:[%s3092_s5 + $0xf0] sm:$0xff] %vm204_vm0, %v1593_v10  ;;  %v1597_v28 = vsub.f32 1.0, %v1596_v44 }
 0x2d0   :  { %v1598_v5 = vmul.f32 %v1907_v7, %v1597_v28 }
 0x2d2   :  { %v1599_v47 = vadd.f32 %v1907_v7, %v1598_v5 }
 0x2d4   :  { %v1603_v6 = vsel %vm1602_vm7, %v1907_v7, %v1599_v47 }
 0x2d5   :  { %v1608_v3 = vsel %vm1605_vm8, %v1607_v53, %v1603_v6 }
 0x2d6   :  { %1641 = vst.msk [vmem:[%s3092_s5 + $0xf8] sm:$0xff] %vm204_vm0, %v1608_v3 }

</bundles_post_ra>
